<compile_context>
chip_gen: v7x
topology: tpu7x:2x2x1
jax: 0.10.0
libtpu: 0.0.40
codegen_flags: <defaults>
</compile_context>

<pallas_src>
import functools

import jax
import jax.numpy as jnp
from jax import lax
from jax.experimental import pallas as pl
from jax.experimental.pallas import tpu as pltpu

_VMEM_LIMIT = 64 * 1024 * 1024  # safe on v5e/v6e (128 MiB) and v7x (64 MiB)


def _round_up(x, m):
    return (x + m - 1) // m * m


def _erf(x):
    # Abramowitz & Stegun 7.1.26, |err| <= 1.5e-7; uses only exp / mul / add /
    # div / select so it lowers cleanly in Mosaic (exp lands on the EUP slot).
    p = jnp.float32(0.3275911)
    a1 = jnp.float32(0.254829592)
    a2 = jnp.float32(-0.284496736)
    a3 = jnp.float32(1.421413741)
    a4 = jnp.float32(-1.453152027)
    a5 = jnp.float32(1.061405429)
    s = jnp.where(x < 0.0, jnp.float32(-1.0), jnp.float32(1.0))
    z = jnp.where(x < 0.0, -x, x)
    t = 1.0 / (1.0 + p * z)
    poly = t * (a1 + t * (a2 + t * (a3 + t * (a4 + t * a5))))
    return s * (1.0 - poly * jnp.exp(-z * z))


def _gelu_exact(x):
    # torch.nn.functional.gelu default (erf form)
    return 0.5 * x * (1.0 + _erf(x * jnp.float32(0.7071067811865476)))


# ----------------------------- Pallas kernels ------------------------------ #

def _router_kernel(x_ref, w_ref, logits_ref, probs_ref, *, n_real):
    # x: (TM, D) bf16; w: (D, Ep) bf16, Ep % 128 == 0 (padded cols are zero)
    logits = jnp.dot(x_ref[...], w_ref[...], preferred_element_type=jnp.float32)
    logits_ref[...] = logits
    # fused softmax over the real experts only (padded lanes -> -inf -> 0)
    lane = lax.broadcasted_iota(jnp.int32, logits.shape, 1)
    masked = jnp.where(lane < n_real, logits, -jnp.inf)
    m = jnp.max(masked, axis=-1, keepdims=True)
    p = jnp.exp(masked - m)
    probs_ref[...] = p / jnp.sum(p, axis=-1, keepdims=True)


def _expert_ffn_kernel(x_ref, w1_ref, b1_ref, g_ref, beta_ref, w2_ref, b2_ref,
                       o_ref):
    # x: (k, D) bf16; w1: (D, F) bf16; b1/g/beta: (1, F) f32;
    # w2: (F, Dout) bf16; b2: (1, Dout) f32; o: (k, Dout) bf16
    h = jnp.dot(x_ref[...], w1_ref[...],
                preferred_element_type=jnp.float32) + b1_ref[...]
    h = _gelu_exact(h)
    # sub-LayerNorm (torchscale subln=True), eps = 1e-5, biased variance, f32
    mean = jnp.mean(h, axis=-1, keepdims=True)
    var = jnp.mean(jnp.square(h - mean), axis=-1, keepdims=True)
    h = (h - mean) * lax.rsqrt(var + jnp.float32(1e-5))
    h = h * g_ref[...] + beta_ref[...]
    y = jnp.dot(h.astype(jnp.bfloat16), w2_ref[...],
                preferred_element_type=jnp.float32) + b2_ref[...]
    o_ref[...] = y.astype(o_ref.dtype)


def _combine_kernel(sel_ref, w_ref, eo_ref, o_ref, *, tq):
    # results[t, d] = sum_r [sel[r] == t] * w[r] * eo[r, d], r = (e, j) flat.
    # sel/w: (1, EK); eo: (EK, Dout) bf16; o: (tq, Dout) f32.
    EK = sel_ref.shape[-1]
    t0 = pl.program_id(1) * tq
    tok = lax.broadcasted_iota(jnp.int32, (tq, EK), 0) + t0
    # weighted one-hot dispatch built on the fly, bf16 into the MXU
    pt = jnp.where(tok == sel_ref[...], w_ref[...],
                   jnp.float32(0.0)).astype(jnp.bfloat16)
    o_ref[...] = jnp.dot(pt, eo_ref[...], preferred_element_type=jnp.float32)


# ------------------------------ wrappers ----------------------------------- #

def router_pallas(x2d_bf, w_t_bf, n_real):
    # x2d_bf: (N, D) bf16; w_t_bf: (D, Ep) bf16, Ep % 128 == 0.
    N, D = x2d_bf.shape
    Ep = w_t_bf.shape[1]
    tm = 512 if N >= 512 else _round_up(N, 8)   # big M-tile: router is HBM-bound
    n_pad = _round_up(N, tm)
    if n_pad != N:
        x2d_bf = jnp.pad(x2d_bf, ((0, n_pad - N), (0, 0)))
    kernel = functools.partial(_router_kernel, n_real=n_real)
    logits, probs = pl.pallas_call(
        kernel,
        out_shape=(jax.ShapeDtypeStruct((n_pad, Ep), jnp.float32),
                   jax.ShapeDtypeStruct((n_pad, Ep), jnp.float32)),
        grid=(n_pad // tm,),
        in_specs=[
            pl.BlockSpec((tm, D), lambda i: (i, 0)),
            pl.BlockSpec((D, Ep), lambda i: (0, 0)),
        ],
        out_specs=(pl.BlockSpec((tm, Ep), lambda i: (i, 0)),
                   pl.BlockSpec((tm, Ep), lambda i: (i, 0))),
        compiler_params=pltpu.CompilerParams(
            dimension_semantics=("parallel",),
            vmem_limit_bytes=_VMEM_LIMIT),
    )(x2d_bf, w_t_bf)
    return logits[:N], probs[:N]


def experts_ffn_pallas(expert_in, w1, b1, g, beta, w2, b2):
    # expert_in: (E, B, k, D) bf16 -> out (B, E, k, Dout) bf16.
    # Grid (E, B): expert weights stay resident across the inner B axis, and
    # the output index_map realizes torch.stack(dim=1) ordering with no
    # materialized transpose.
    E, B, K, D = expert_in.shape
    F = w1.shape[-1]
    Dout = w2.shape[-1]
    return pl.pallas_call(
        _expert_ffn_kernel,
        out_shape=jax.ShapeDtypeStruct((B, E, K, Dout), jnp.bfloat16),
        grid=(E, B),
        in_specs=[
            pl.BlockSpec((None, None, K, D), lambda e, b: (e, b, 0, 0)),
            pl.BlockSpec((None, D, F), lambda e, b: (e, 0, 0)),
            pl.BlockSpec((None, 1, F), lambda e, b: (e, 0, 0)),
            pl.BlockSpec((None, 1, F), lambda e, b: (e, 0, 0)),
            pl.BlockSpec((None, 1, F), lambda e, b: (e, 0, 0)),
            pl.BlockSpec((None, F, Dout), lambda e, b: (e, 0, 0)),
            pl.BlockSpec((None, 1, Dout), lambda e, b: (e, 0, 0)),
        ],
        out_specs=pl.BlockSpec((None, None, K, Dout), lambda e, b: (b, e, 0, 0)),
        compiler_params=pltpu.CompilerParams(
            dimension_semantics=("parallel", "parallel"),
            vmem_limit_bytes=_VMEM_LIMIT),
    )(expert_in, w1, b1, g, beta, w2, b2)


def combine_pallas(sel, wts, eo, seq_len):
    # sel/wts: (B, 1, EK); eo: (B, EK, Dout) bf16; returns (B, S, Dout) f32.
    B, _, EK = sel.shape
    Dout = eo.shape[-1]
    tq = seq_len
    for cand in (512, 256, 128):
        if seq_len % cand == 0:
            tq = cand
            break
    kernel = functools.partial(_combine_kernel, tq=tq)
    return pl.pallas_call(
        kernel,
        out_shape=jax.ShapeDtypeStruct((B, seq_len, Dout), jnp.float32),
        grid=(B, seq_len // tq),
        in_specs=[
            pl.BlockSpec((None, 1, EK), lambda b, t: (b, 0, 0)),
            pl.BlockSpec((None, 1, EK), lambda b, t: (b, 0, 0)),
            pl.BlockSpec((None, EK, Dout), lambda b, t: (b, 0, 0)),
        ],
        out_specs=pl.BlockSpec((None, tq, Dout), lambda b, t: (b, t, 0)),
        compiler_params=pltpu.CompilerParams(
            dimension_semantics=("parallel", "parallel"),
            vmem_limit_bytes=_VMEM_LIMIT),
    )(sel, wts, eo)


# ------------------------------ PAMoE forward ------------------------------ #

@functools.partial(jax.jit, static_argnames=("capacity_factor", "softmax_order"))
def pamoe_forward(inputs, params, *, capacity_factor=1.0,
                  softmax_order="softmax_topk"):
    B, S, D = inputs.shape
    E = params["w1"].shape[0]
    top_k = max(1, int(capacity_factor * S / E))
    EK = E * top_k

    # NOTE: router / experts run with bf16 MXU inputs and f32 accumulation;
    # returned logits / results differ from an f32 reference at bf16 level.
    x2d_bf = inputs.reshape(B * S, D).astype(jnp.bfloat16)

    # ---- router matmul + fused softmax (Pallas) ----
    logits_pad, probs_pad = router_pallas(x2d_bf, params["router_t_pad"], E)
    router_logits = logits_pad[:, :E].reshape(B, S, E)

    if softmax_order == "softmax_topk":
        probs = probs_pad[:, :E].reshape(B, S, E)
        weights, selected = lax.top_k(jnp.transpose(probs, (0, 2, 1)), top_k)
    elif softmax_order == "topk_softmax":
        weights, selected = lax.top_k(
            jnp.transpose(router_logits, (0, 2, 1)), top_k)
        weights = jax.nn.softmax(weights, axis=-1)
    else:
        raise ValueError(f"Unsupported softmax order: {softmax_order}")
    # weights/selected: (B, E, top_k)

    # ---- token gather: reproduce the reference's expert-slicing permutation
    # (expert e's local batch b consumes flat dispatch row e*B + b).
    rows = selected + jnp.arange(B, dtype=selected.dtype)[:, None, None] * S
    expert_rows = rows.reshape(E, B, top_k)           # (E, B, k) flat row ids
    expert_in = x2d_bf[expert_rows]                   # (E, B, k, D) bf16
    # TODO(synk): fuse this gather into the FFN kernel via scalar-prefetch row
    # ids + per-row make_async_copy from HBM (memory_space=pl.ANY).

    # ---- per-expert FFN (Pallas): fc1 -> gelu -> layernorm -> fc2 ----
    eo4 = experts_ffn_pallas(
        expert_in, params["w1"], params["b1"], params["ln_g"], params["ln_b"],
        params["w2"], params["b2"])                   # (B, E, k, Dout) bf16
    Dout = eo4.shape[-1]

    # ---- combine: einsum 'bejt,bej,bejd->btd', contraction over E*k ----
    results = combine_pallas(selected.reshape(B, 1, EK),
                             weights.reshape(B, 1, EK).astype(jnp.float32),
                             eo4.reshape(B, EK, Dout), S)   # free reshape
    return results, router_logits


# ------------------------------ params ------------------------------------- #

def init_pamoe_params(key, dim, n_experts, ffn_mult=2, out_dim=None):
    out_dim = dim if out_dim is None else out_dim
    ffn_dim = int(dim * ffn_mult)
    ks = jax.random.split(key, 5)
    scale = 0.02
    return {
        "router_t": scale * jax.random.normal(ks[0], (dim, n_experts), jnp.float32),
        "w1": scale * jax.random.normal(ks[1], (n_experts, dim, ffn_dim), jnp.float32),
        "b1": scale * jax.random.normal(ks[2], (n_experts, 1, ffn_dim), jnp.float32),
        "ln_g": jnp.ones((n_experts, 1, ffn_dim), jnp.float32),
        "ln_b": jnp.zeros((n_experts, 1, ffn_dim), jnp.float32),
        "w2": scale * jax.random.normal(ks[3], (n_experts, ffn_dim, out_dim), jnp.float32),
        "b2": scale * jax.random.normal(ks[4], (n_experts, 1, out_dim), jnp.float32),
    }


def prepare_params(params):
    """One-time prep OUTSIDE the jitted hot path: pad router weight to 128
    lanes and cast the MXU weights to bf16 (avoids per-call weight casts)."""
    dim, n_experts = params["router_t"].shape
    ep = _round_up(n_experts, 128)
    return {
        "router_t_pad": jnp.pad(
            params["router_t"], ((0, 0), (0, ep - n_experts))).astype(jnp.bfloat16),
        "w1": params["w1"].astype(jnp.bfloat16),
        "b1": params["b1"].astype(jnp.float32),
        "ln_g": params["ln_g"].astype(jnp.float32),
        "ln_b": params["ln_b"].astype(jnp.float32),
        "w2": params["w2"].astype(jnp.bfloat16),
        "b2": params["b2"].astype(jnp.float32),
    }


if __name__ == "__main__":
    key = jax.random.PRNGKey(0)
    kx, kp = jax.random.split(key)

    # small shapes consistent with the module
    B, S, D = 2, 16, 32
    num_expert_extra, num_expert_proto = 2, 4
    E = num_expert_extra + num_expert_proto           # 6 experts
    ffn_mult = 2

    x = jax.random.normal(kx, (B, S, D), jnp.float32)
    raw_params = init_pamoe_params(kp, D, E, ffn_mult=ffn_mult, out_dim=None)
    params = prepare_params(raw_params)

    # TODO(synk): dropout inside FeedForwardNetwork is omitted (eval mode).
    results, router_logits = pamoe_forward(x, params, capacity_factor=1.0,
                                           softmax_order="softmax_topk")
    jax.block_until_ready((results, router_logits))
    assert results.shape == (B, S, D)
    assert router_logits.shape == (B, S, E)
    print("KERNEL_OK")
</pallas_src>

<mosaic_0001>
module attributes {stable_mosaic.version = 11 : i64} {
  func.func @_router_kernel(%arg0: i32, %arg1: memref<32x32xbf16, #tpu.memory_space<vmem>>, %arg2: memref<32x128xbf16, #tpu.memory_space<vmem>>, %arg3: memref<32x128xf32, #tpu.memory_space<vmem>>, %arg4: memref<32x128xf32, #tpu.memory_space<vmem>>) attributes {dimension_semantics = [#tpu.dimension_semantics<parallel>], iteration_bounds = array<i64: 1>, scalar_prefetch = 0 : i64, scratch_operands = 0 : i64, tpu.core_type = #tpu.core_type<tc>, window_params = [{transform_indices = @transform_0, window_bounds = array<i64: 32, 32>}, {pipeline_mode = #tpu.pipeline_mode<synchronous>, transform_indices = @transform_1, window_bounds = array<i64: 32, 128>}, {transform_indices = @transform_2, window_bounds = array<i64: 32, 128>}, {transform_indices = @transform_3, window_bounds = array<i64: 32, 128>}]} {
    %c0 = arith.constant 0 : index
    %c0_0 = arith.constant 0 : index
    %0 = vector.load %arg1[%c0, %c0_0] : memref<32x32xbf16, #tpu.memory_space<vmem>>, vector<32x32xbf16>
    %c0_1 = arith.constant 0 : index
    %c0_2 = arith.constant 0 : index
    %1 = vector.load %arg2[%c0_1, %c0_2] : memref<32x128xbf16, #tpu.memory_space<vmem>>, vector<32x128xbf16>
    %cst = arith.constant dense<0.000000e+00> : vector<32x128xf32>
    %2 = tpu.matmul %0, %1, %cst {dimension_numbers = #tpu.dot_dimension_numbers<[1], [0], [0], [1], [0, 0, 1, 1], [], []>} : vector<32x32xbf16>, vector<32x128xbf16>, vector<32x128xf32> -> vector<32x128xf32>
    %c0_3 = arith.constant 0 : index
    %c0_4 = arith.constant 0 : index
    %3 = vector.load %arg3[%c0_3, %c0_4] : memref<32x128xf32, #tpu.memory_space<vmem>>, vector<32x128xf32>
    tpu.vector_store %arg3[%c0_3, %c0_4], %2 {strides = array<i32>} : memref<32x128xf32, #tpu.memory_space<vmem>>, vector<32x128xf32>,
    %4 = tpu.iota {dimensions = array<i32: 1>} : vector<32x128xi32>
    %c6_i32 = arith.constant 6 : i32
    %5 = vector.broadcast %c6_i32 : i32 to vector<32x128xi32>
    %6 = arith.cmpi slt, %4, %5 : vector<32x128xi32>
    %cst_5 = arith.constant 0xFF800000 : f32
    %7 = vector.broadcast %cst_5 : f32 to vector<32x128xf32>
    %8 = arith.select %6, %2, %7 : vector<32x128xi1>, vector<32x128xf32>
    %cst_6 = arith.constant dense<0xFF800000> : vector<32xf32>
    %9 = vector.multi_reduction <maximumf>, %8, %cst_6 [1] : vector<32x128xf32> to vector<32xf32>
    %10 = vector.shape_cast %9 : vector<32xf32> to vector<32x1xf32>
    %11 = vector.broadcast %10 : vector<32x1xf32> to vector<32x128xf32>
    %12 = arith.subf %8, %11 : vector<32x128xf32>
    %13 = math.exp %12 : vector<32x128xf32>
    %cst_7 = arith.constant dense<0.000000e+00> : vector<32xf32>
    %14 = vector.multi_reduction <add>, %13, %cst_7 [1] : vector<32x128xf32> to vector<32xf32>
    %15 = vector.shape_cast %14 : vector<32xf32> to vector<32x1xf32>
    %16 = vector.broadcast %15 : vector<32x1xf32> to vector<32x128xf32>
    %17 = arith.divf %13, %16 : vector<32x128xf32>
    %c0_8 = arith.constant 0 : index
    %c0_9 = arith.constant 0 : index
    %18 = vector.load %arg4[%c0_8, %c0_9] : memref<32x128xf32, #tpu.memory_space<vmem>>, vector<32x128xf32>
    tpu.vector_store %arg4[%c0_8, %c0_9], %17 {strides = array<i32>} : memref<32x128xf32, #tpu.memory_space<vmem>>, vector<32x128xf32>,
    return
  }
  func.func @transform_0(%arg0: i32) -> (i32, i32) {
    %c0_i32 = arith.constant 0 : i32
    %c0_i32_0 = arith.constant 0 : i32
    return %arg0, %c0_i32 : i32, i32
  }
  func.func @transform_1(%arg0: i32) -> (i32, i32) {
    %c0_i32 = arith.constant 0 : i32
    %c0_i32_0 = arith.constant 0 : i32
    %c0_i32_1 = arith.constant 0 : i32
    return %c0_i32, %c0_i32_0 : i32, i32
  }
  func.func @transform_2(%arg0: i32) -> (i32, i32) {
    %c0_i32 = arith.constant 0 : i32
    %c0_i32_0 = arith.constant 0 : i32
    return %arg0, %c0_i32 : i32, i32
  }
  func.func @transform_3(%arg0: i32) -> (i32, i32) {
    %c0_i32 = arith.constant 0 : i32
    %c0_i32_0 = arith.constant 0 : i32
    return %arg0, %c0_i32 : i32, i32
  }
}

module attributes {stable_mosaic.version = 11 : i64} {
  func.func @_expert_ffn_kernel(%arg0: i32, %arg1: i32, %arg2: memref<1x1x2x32xbf16, #tpu.memory_space<vmem>>, %arg3: memref<1x32x64xbf16, #tpu.memory_space<vmem>>, %arg4: memref<1x1x64xf32, #tpu.memory_space<vmem>>, %arg5: memref<1x1x64xf32, #tpu.memory_space<vmem>>, %arg6: memref<1x1x64xf32, #tpu.memory_space<vmem>>, %arg7: memref<1x64x32xbf16, #tpu.memory_space<vmem>>, %arg8: memref<1x1x32xf32, #tpu.memory_space<vmem>>, %arg9: memref<1x1x2x32xbf16, #tpu.memory_space<vmem>>) attributes {dimension_semantics = [#tpu.dimension_semantics<parallel>, #tpu.dimension_semantics<parallel>], iteration_bounds = array<i64: 6, 2>, scalar_prefetch = 0 : i64, scratch_operands = 0 : i64, tpu.core_type = #tpu.core_type<tc>, window_params = [{transform_indices = @transform_0, window_bounds = array<i64: 1, 1, 2, 32>}, {transform_indices = @transform_1, window_bounds = array<i64: 1, 32, 64>}, {transform_indices = @transform_2, window_bounds = array<i64: 1, 1, 64>}, {transform_indices = @transform_3, window_bounds = array<i64: 1, 1, 64>}, {transform_indices = @transform_4, window_bounds = array<i64: 1, 1, 64>}, {transform_indices = @transform_5, window_bounds = array<i64: 1, 64, 32>}, {transform_indices = @transform_6, window_bounds = array<i64: 1, 1, 32>}, {transform_indices = @transform_7, window_bounds = array<i64: 1, 1, 2, 32>}]} {
    %c0 = arith.constant 0 : index
    %c0_0 = arith.constant 0 : index
    %c0_1 = arith.constant 0 : index
    %c0_2 = arith.constant 0 : index
    %0 = vector.load %arg2[%c0, %c0_0, %c0_1, %c0_2] : memref<1x1x2x32xbf16, #tpu.memory_space<vmem>>, vector<1x1x2x32xbf16>
    %1 = vector.shape_cast %0 : vector<1x1x2x32xbf16> to vector<2x32xbf16>
    %c0_3 = arith.constant 0 : index
    %c0_4 = arith.constant 0 : index
    %c0_5 = arith.constant 0 : index
    %2 = vector.load %arg3[%c0_3, %c0_4, %c0_5] : memref<1x32x64xbf16, #tpu.memory_space<vmem>>, vector<1x32x64xbf16>
    %3 = vector.shape_cast %2 : vector<1x32x64xbf16> to vector<32x64xbf16>
    %cst = arith.constant dense<0.000000e+00> : vector<2x64xf32>
    %4 = tpu.matmul %1, %3, %cst {dimension_numbers = #tpu.dot_dimension_numbers<[1], [0], [0], [1], [0, 0, 1, 1], [], []>} : vector<2x32xbf16>, vector<32x64xbf16>, vector<2x64xf32> -> vector<2x64xf32>
    %c0_6 = arith.constant 0 : index
    %c0_7 = arith.constant 0 : index
    %c0_8 = arith.constant 0 : index
    %5 = vector.load %arg4[%c0_6, %c0_7, %c0_8] : memref<1x1x64xf32, #tpu.memory_space<vmem>>, vector<1x1x64xf32>
    %6 = vector.shape_cast %5 : vector<1x1x64xf32> to vector<1x64xf32>
    %7 = vector.broadcast %6 : vector<1x64xf32> to vector<2x64xf32>
    %8 = arith.addf %4, %7 : vector<2x64xf32>
    %cst_9 = arith.constant 5.000000e-01 : f32
    %9 = vector.broadcast %cst_9 : f32 to vector<2x64xf32>
    %10 = arith.mulf %9, %8 : vector<2x64xf32>
    %cst_10 = arith.constant 0.707106769 : f32
    %11 = vector.broadcast %cst_10 : f32 to vector<2x64xf32>
    %12 = arith.mulf %8, %11 : vector<2x64xf32>
    %cst_11 = arith.constant 0.000000e+00 : f32
    %13 = vector.broadcast %cst_11 : f32 to vector<2x64xf32>
    %14 = arith.cmpf olt, %12, %13 : vector<2x64xf32>
    %cst_12 = arith.constant -1.000000e+00 : f32
    %cst_13 = arith.constant 1.000000e+00 : f32
    %15 = vector.broadcast %cst_12 : f32 to vector<2x64xf32>
    %16 = vector.broadcast %cst_13 : f32 to vector<2x64xf32>
    %17 = arith.select %14, %15, %16 : vector<2x64xi1>, vector<2x64xf32>
    %cst_14 = arith.constant 0.000000e+00 : f32
    %18 = vector.broadcast %cst_14 : f32 to vector<2x64xf32>
    %19 = arith.cmpf olt, %12, %18 : vector<2x64xf32>
    %cst_15 = arith.constant 0.000000e+00 : f32
    %20 = vector.broadcast %cst_15 : f32 to vector<2x64xf32>
    %21 = arith.subf %20, %12 : vector<2x64xf32>
    %22 = arith.select %19, %21, %12 : vector<2x64xi1>, vector<2x64xf32>
    %cst_16 = arith.constant 0.327591091 : f32
    %23 = vector.broadcast %cst_16 : f32 to vector<2x64xf32>
    %24 = arith.mulf %23, %22 : vector<2x64xf32>
    %cst_17 = arith.constant 1.000000e+00 : f32
    %25 = vector.broadcast %cst_17 : f32 to vector<2x64xf32>
    %26 = arith.addf %25, %24 : vector<2x64xf32>
    %cst_18 = arith.constant 1.000000e+00 : f32
    %27 = vector.broadcast %cst_18 : f32 to vector<2x64xf32>
    %28 = arith.divf %27, %26 : vector<2x64xf32>
    %cst_19 = arith.constant 1.06140542 : f32
    %29 = vector.broadcast %cst_19 : f32 to vector<2x64xf32>
    %30 = arith.mulf %28, %29 : vector<2x64xf32>
    %cst_20 = arith.constant -1.45315206 : f32
    %31 = vector.broadcast %cst_20 : f32 to vector<2x64xf32>
    %32 = arith.addf %31, %30 : vector<2x64xf32>
    %33 = arith.mulf %28, %32 : vector<2x64xf32>
    %cst_21 = arith.constant 1.42141378 : f32
    %34 = vector.broadcast %cst_21 : f32 to vector<2x64xf32>
    %35 = arith.addf %34, %33 : vector<2x64xf32>
    %36 = arith.mulf %28, %35 : vector<2x64xf32>
    %cst_22 = arith.constant -0.284496725 : f32
    %37 = vector.broadcast %cst_22 : f32 to vector<2x64xf32>
    %38 = arith.addf %37, %36 : vector<2x64xf32>
    %39 = arith.mulf %28, %38 : vector<2x64xf32>
    %cst_23 = arith.constant 0.254829586 : f32
    %40 = vector.broadcast %cst_23 : f32 to vector<2x64xf32>
    %41 = arith.addf %40, %39 : vector<2x64xf32>
    %42 = arith.mulf %28, %41 : vector<2x64xf32>
    %cst_24 = arith.constant 0.000000e+00 : f32
    %43 = vector.broadcast %cst_24 : f32 to vector<2x64xf32>
    %44 = arith.subf %43, %22 : vector<2x64xf32>
    %45 = arith.mulf %44, %22 : vector<2x64xf32>
    %46 = math.exp %45 : vector<2x64xf32>
    %47 = arith.mulf %42, %46 : vector<2x64xf32>
    %cst_25 = arith.constant 1.000000e+00 : f32
    %48 = vector.broadcast %cst_25 : f32 to vector<2x64xf32>
    %49 = arith.subf %48, %47 : vector<2x64xf32>
    %50 = arith.mulf %17, %49 : vector<2x64xf32>
    %cst_26 = arith.constant 1.000000e+00 : f32
    %51 = vector.broadcast %cst_26 : f32 to vector<2x64xf32>
    %52 = arith.addf %51, %50 : vector<2x64xf32>
    %53 = arith.mulf %10, %52 : vector<2x64xf32>
    %cst_27 = arith.constant dense<0.000000e+00> : vector<2xf32>
    %54 = vector.multi_reduction <add>, %53, %cst_27 [1] : vector<2x64xf32> to vector<2xf32>
    %55 = vector.shape_cast %54 : vector<2xf32> to vector<2x1xf32>
    %cst_28 = arith.constant 6.400000e+01 : f32
    %56 = vector.broadcast %cst_28 : f32 to vector<2x1xf32>
    %57 = arith.divf %55, %56 : vector<2x1xf32>
    %58 = vector.broadcast %57 : vector<2x1xf32> to vector<2x64xf32>
    %59 = arith.subf %53, %58 : vector<2x64xf32>
    %60 = arith.mulf %59, %59 : vector<2x64xf32>
    %cst_29 = arith.constant dense<0.000000e+00> : vector<2xf32>
    %61 = vector.multi_reduction <add>, %60, %cst_29 [1] : vector<2x64xf32> to vector<2xf32>
    %62 = vector.shape_cast %61 : vector<2xf32> to vector<2x1xf32>
    %cst_30 = arith.constant 6.400000e+01 : f32
    %63 = vector.broadcast %cst_30 : f32 to vector<2x1xf32>
    %64 = arith.divf %62, %63 : vector<2x1xf32>
    %65 = vector.broadcast %57 : vector<2x1xf32> to vector<2x64xf32>
    %66 = arith.subf %53, %65 : vector<2x64xf32>
    %cst_31 = arith.constant 9.99999974E-6 : f32
    %67 = vector.broadcast %cst_31 : f32 to vector<2x1xf32>
    %68 = arith.addf %64, %67 : vector<2x1xf32>
    %69 = math.rsqrt %68 : vector<2x1xf32>
    %70 = vector.broadcast %69 : vector<2x1xf32> to vector<2x64xf32>
    %71 = arith.mulf %66, %70 : vector<2x64xf32>
    %c0_32 = arith.constant 0 : index
    %c0_33 = arith.constant 0 : index
    %c0_34 = arith.constant 0 : index
    %72 = vector.load %arg5[%c0_32, %c0_33, %c0_34] : memref<1x1x64xf32, #tpu.memory_space<vmem>>, vector<1x1x64xf32>
    %73 = vector.shape_cast %72 : vector<1x1x64xf32> to vector<1x64xf32>
    %74 = vector.broadcast %73 : vector<1x64xf32> to vector<2x64xf32>
    %75 = arith.mulf %71, %74 : vector<2x64xf32>
    %c0_35 = arith.constant 0 : index
    %c0_36 = arith.constant 0 : index
    %c0_37 = arith.constant 0 : index
    %76 = vector.load %arg6[%c0_35, %c0_36, %c0_37] : memref<1x1x64xf32, #tpu.memory_space<vmem>>, vector<1x1x64xf32>
    %77 = vector.shape_cast %76 : vector<1x1x64xf32> to vector<1x64xf32>
    %78 = vector.broadcast %77 : vector<1x64xf32> to vector<2x64xf32>
    %79 = arith.addf %75, %78 : vector<2x64xf32>
    %80 = arith.truncf %79 : vector<2x64xf32> to vector<2x64xbf16>
    %c0_38 = arith.constant 0 : index
    %c0_39 = arith.constant 0 : index
    %c0_40 = arith.constant 0 : index
    %81 = vector.load %arg7[%c0_38, %c0_39, %c0_40] : memref<1x64x32xbf16, #tpu.memory_space<vmem>>, vector<1x64x32xbf16>
    %82 = vector.shape_cast %81 : vector<1x64x32xbf16> to vector<64x32xbf16>
    %cst_41 = arith.constant dense<0.000000e+00> : vector<2x32xf32>
    %83 = tpu.matmul %80, %82, %cst_41 {dimension_numbers = #tpu.dot_dimension_numbers<[1], [0], [0], [1], [0, 0, 1, 1], [], []>} : vector<2x64xbf16>, vector<64x32xbf16>, vector<2x32xf32> -> vector<2x32xf32>
    %c0_42 = arith.constant 0 : index
    %c0_43 = arith.constant 0 : index
    %c0_44 = arith.constant 0 : index
    %84 = vector.load %arg8[%c0_42, %c0_43, %c0_44] : memref<1x1x32xf32, #tpu.memory_space<vmem>>, vector<1x1x32xf32>
    %85 = vector.shape_cast %84 : vector<1x1x32xf32> to vector<1x32xf32>
    %86 = vector.broadcast %85 : vector<1x32xf32> to vector<2x32xf32>
    %87 = arith.addf %83, %86 : vector<2x32xf32>
    %88 = arith.truncf %87 : vector<2x32xf32> to vector<2x32xbf16>
    %c0_45 = arith.constant 0 : index
    %c0_46 = arith.constant 0 : index
    %c0_47 = arith.constant 0 : index
    %c0_48 = arith.constant 0 : index
    %89 = vector.load %arg9[%c0_45, %c0_46, %c0_47, %c0_48] : memref<1x1x2x32xbf16, #tpu.memory_space<vmem>>, vector<1x1x2x32xbf16>
    %90 = vector.shape_cast %89 : vector<1x1x2x32xbf16> to vector<2x32xbf16>
    %91 = vector.shape_cast %88 : vector<2x32xbf16> to vector<1x1x2x32xbf16>
    tpu.vector_store %arg9[%c0_45, %c0_46, %c0_47, %c0_48], %91 {strides = array<i32>} : memref<1x1x2x32xbf16, #tpu.memory_space<vmem>>, vector<1x1x2x32xbf16>,
    return
  }
  func.func @transform_0(%arg0: i32, %arg1: i32) -> (i32, i32, i32, i32) {
    %c0_i32 = arith.constant 0 : i32
    %c0_i32_0 = arith.constant 0 : i32
    %c0_i32_1 = arith.constant 0 : i32
    return %arg0, %arg1, %c0_i32, %c0_i32_0 : i32, i32, i32, i32
  }
  func.func @transform_1(%arg0: i32, %arg1: i32) -> (i32, i32, i32) {
    %c0_i32 = arith.constant 0 : i32
    %c0_i32_0 = arith.constant 0 : i32
    %c0_i32_1 = arith.constant 0 : i32
    return %arg0, %c0_i32, %c0_i32_0 : i32, i32, i32
  }
  func.func @transform_2(%arg0: i32, %arg1: i32) -> (i32, i32, i32) {
    %c0_i32 = arith.constant 0 : i32
    %c0_i32_0 = arith.constant 0 : i32
    %c0_i32_1 = arith.constant 0 : i32
    return %arg0, %c0_i32, %c0_i32_0 : i32, i32, i32
  }
  func.func @transform_3(%arg0: i32, %arg1: i32) -> (i32, i32, i32) {
    %c0_i32 = arith.constant 0 : i32
    %c0_i32_0 = arith.constant 0 : i32
    %c0_i32_1 = arith.constant 0 : i32
    return %arg0, %c0_i32, %c0_i32_0 : i32, i32, i32
  }
  func.func @transform_4(%arg0: i32, %arg1: i32) -> (i32, i32, i32) {
    %c0_i32 = arith.constant 0 : i32
    %c0_i32_0 = arith.constant 0 : i32
    %c0_i32_1 = arith.constant 0 : i32
    return %arg0, %c0_i32, %c0_i32_0 : i32, i32, i32
  }
  func.func @transform_5(%arg0: i32, %arg1: i32) -> (i32, i32, i32) {
    %c0_i32 = arith.constant 0 : i32
    %c0_i32_0 = arith.constant 0 : i32
    %c0_i32_1 = arith.constant 0 : i32
    return %arg0, %c0_i32, %c0_i32_0 : i32, i32, i32
  }
  func.func @transform_6(%arg0: i32, %arg1: i32) -> (i32, i32, i32) {
    %c0_i32 = arith.constant 0 : i32
    %c0_i32_0 = arith.constant 0 : i32
    %c0_i32_1 = arith.constant 0 : i32
    return %arg0, %c0_i32, %c0_i32_0 : i32, i32, i32
  }
  func.func @transform_7(%arg0: i32, %arg1: i32) -> (i32, i32, i32, i32) {
    %c0_i32 = arith.constant 0 : i32
    %c0_i32_0 = arith.constant 0 : i32
    %c0_i32_1 = arith.constant 0 : i32
    return %arg1, %arg0, %c0_i32, %c0_i32_0 : i32, i32, i32, i32
  }
}

module attributes {stable_mosaic.version = 11 : i64} {
  func.func @_combine_kernel(%arg0: i32, %arg1: i32, %arg2: memref<1x1x12xi32, #tpu.memory_space<vmem>>, %arg3: memref<1x1x12xf32, #tpu.memory_space<vmem>>, %arg4: memref<1x12x32xbf16, #tpu.memory_space<vmem>>, %arg5: memref<1x16x32xf32, #tpu.memory_space<vmem>>) attributes {dimension_semantics = [#tpu.dimension_semantics<parallel>, #tpu.dimension_semantics<parallel>], iteration_bounds = array<i64: 2, 1>, scalar_prefetch = 0 : i64, scratch_operands = 0 : i64, tpu.core_type = #tpu.core_type<tc>, window_params = [{transform_indices = @transform_0, window_bounds = array<i64: 1, 1, 12>}, {transform_indices = @transform_1, window_bounds = array<i64: 1, 1, 12>}, {transform_indices = @transform_2, window_bounds = array<i64: 1, 12, 32>}, {transform_indices = @transform_3, window_bounds = array<i64: 1, 16, 32>}]} {
    %c16_i32 = arith.constant 16 : i32
    %0 = arith.muli %arg1, %c16_i32 : i32
    %1 = tpu.iota {dimensions = array<i32: 0>} : vector<16x12xi32>
    %2 = vector.broadcast %0 : i32 to vector<16x12xi32>
    %3 = arith.addi %1, %2 : vector<16x12xi32>
    %c0 = arith.constant 0 : index
    %c0_0 = arith.constant 0 : index
    %c0_1 = arith.constant 0 : index
    %4 = vector.load %arg2[%c0, %c0_0, %c0_1] : memref<1x1x12xi32, #tpu.memory_space<vmem>>, vector<1x1x12xi32>
    %5 = vector.shape_cast %4 : vector<1x1x12xi32> to vector<1x12xi32>
    %6 = vector.broadcast %5 : vector<1x12xi32> to vector<16x12xi32>
    %7 = arith.cmpi eq, %3, %6 : vector<16x12xi32>
    %c0_2 = arith.constant 0 : index
    %c0_3 = arith.constant 0 : index
    %c0_4 = arith.constant 0 : index
    %8 = vector.load %arg3[%c0_2, %c0_3, %c0_4] : memref<1x1x12xf32, #tpu.memory_space<vmem>>, vector<1x1x12xf32>
    %9 = vector.shape_cast %8 : vector<1x1x12xf32> to vector<1x12xf32>
    %cst = arith.constant 0.000000e+00 : f32
    %10 = vector.shape_cast %9 : vector<1x12xf32> to vector<1x12xf32>
    %11 = vector.broadcast %10 : vector<1x12xf32> to vector<16x12xf32>
    %12 = vector.broadcast %cst : f32 to vector<16x12xf32>
    %13 = arith.select %7, %11, %12 : vector<16x12xi1>, vector<16x12xf32>
    %14 = arith.truncf %13 : vector<16x12xf32> to vector<16x12xbf16>
    %c0_5 = arith.constant 0 : index
    %c0_6 = arith.constant 0 : index
    %c0_7 = arith.constant 0 : index
    %15 = vector.load %arg4[%c0_5, %c0_6, %c0_7] : memref<1x12x32xbf16, #tpu.memory_space<vmem>>, vector<1x12x32xbf16>
    %16 = vector.shape_cast %15 : vector<1x12x32xbf16> to vector<12x32xbf16>
    %cst_8 = arith.constant dense<0.000000e+00> : vector<16x32xf32>
    %17 = tpu.matmul %14, %16, %cst_8 {dimension_numbers = #tpu.dot_dimension_numbers<[1], [0], [0], [1], [0, 0, 1, 1], [], []>} : vector<16x12xbf16>, vector<12x32xbf16>, vector<16x32xf32> -> vector<16x32xf32>
    %c0_9 = arith.constant 0 : index
    %c0_10 = arith.constant 0 : index
    %c0_11 = arith.constant 0 : index
    %18 = vector.load %arg5[%c0_9, %c0_10, %c0_11] : memref<1x16x32xf32, #tpu.memory_space<vmem>>, vector<1x16x32xf32>
    %19 = vector.shape_cast %18 : vector<1x16x32xf32> to vector<16x32xf32>
    %20 = vector.shape_cast %17 : vector<16x32xf32> to vector<1x16x32xf32>
    tpu.vector_store %arg5[%c0_9, %c0_10, %c0_11], %20 {strides = array<i32>} : memref<1x16x32xf32, #tpu.memory_space<vmem>>, vector<1x16x32xf32>,
    return
  }
  func.func @transform_0(%arg0: i32, %arg1: i32) -> (i32, i32, i32) {
    %c0_i32 = arith.constant 0 : i32
    %c0_i32_0 = arith.constant 0 : i32
    %c0_i32_1 = arith.constant 0 : i32
    return %arg0, %c0_i32, %c0_i32_0 : i32, i32, i32
  }
  func.func @transform_1(%arg0: i32, %arg1: i32) -> (i32, i32, i32) {
    %c0_i32 = arith.constant 0 : i32
    %c0_i32_0 = arith.constant 0 : i32
    %c0_i32_1 = arith.constant 0 : i32
    return %arg0, %c0_i32, %c0_i32_0 : i32, i32, i32
  }
  func.func @transform_2(%arg0: i32, %arg1: i32) -> (i32, i32, i32) {
    %c0_i32 = arith.constant 0 : i32
    %c0_i32_0 = arith.constant 0 : i32
    %c0_i32_1 = arith.constant 0 : i32
    return %arg0, %c0_i32, %c0_i32_0 : i32, i32, i32
  }
  func.func @transform_3(%arg0: i32, %arg1: i32) -> (i32, i32, i32) {
    %c0_i32 = arith.constant 0 : i32
    %c0_i32_0 = arith.constant 0 : i32
    return %arg0, %arg1, %c0_i32 : i32, i32, i32
  }
}

</mosaic_0001>

<bundles_post_ra>
// kernel: pamoe_forward.3
= control target key start
LH: loop header
LB: loop body
LE: loop exit
PB: predicated region body
PF: predicated region fallthrough
CT: control target
= control target key end

     0   :  { %9 = vsyncpa [#allocation3], 0  ;;  %s439_s0 = inlined_call_operand.hbm [shape: bf16[32,32], index: 0, kind: input, shape index: {}]   ;;  %s440_s1 = inlined_call_operand.hbm [shape: bf16[32,128], index: 1, kind: input, shape index: {}]   ;;  %s441_s2 = inlined_call_operand.hbm [shape: f32[32,128], index: 2, kind: output, shape index: {0}]   ;;  %s442_s3 = inlined_call_operand.hbm [shape: f32[32,128], index: 3, kind: output, shape index: {1}]  }
   0x1   :  { %10 = vsyncpa [#allocation6], 0 }
   0x2   :  { %11 = vsyncpa [#allocation4], 0 }
   0x3   :  { %12 = vsyncpa [#allocation9], 0  ;;  %s357_s12 = smov [#allocation2]   ;;  %s261_s16 = scalar_lea.hbm %s439_s0, 256 }
   0x4   :  { %s18_s13 = sshll.u32 %s357_s12, 4  ;;  %p262_p0 = scmp.ne.s32.totalorder %s439_s0, %s261_s16  ;;  %s19_s13 = int_to_ptr.vmem [resolvable:$true] %s18_s13 }
   0x5   :  { %p265_p1 = scmp.lt.u32.totalorder %s261_s16, %s439_s0 }
   0x7   :  { %p267_p2 = pnand %p265_p1, %p262_p0 }
   0x9   :  { %270 = shalt.err (!%p267_p2)
}
   0xa   :  { %s271_s21 = scalar_lea.vmem %s19_s13, 256  ;;  %p276_p4 = scmp.lt.s32.totalorder %s19_s13, %s19_s13 }
   0xb   :  { %p272_p3 = scmp.ne.s32.totalorder %s19_s13, %s271_s21  ;;  %p277_p5 = scmp.lt.s32.totalorder %s271_s21, %s271_s21 }
   0xd   :  { %p278_p6 = por %p277_p5, %p276_p4 }
   0xf   :  { %p279_p7 = pnand %p278_p6, %p272_p3 }
  0x11   :  { %282 = shalt.err (!%p279_p7)
}
  0x12   :  { %s358_s22 = smov 64   ;;  %s359_s23 = smov 4  }
  0x13   :  { %24 = dma.hbm_to_vmem [thread:$0]  %s439_s0, 256, %s19_s13, [#allocation3], %s358_s22, %s358_s22, %s359_s23  }
  0x14   :  { %s360_s26 = smov [#allocation5]   ;;  %s283_s30 = scalar_lea.hbm %s440_s1, 256 }
  0x15   :  { %s30_s27 = sshll.u32 %s360_s26, 4  ;;  %p284_p8 = scmp.ne.s32.totalorder %s440_s1, %s283_s30  ;;  %s31_s27 = int_to_ptr.vmem [resolvable:$true] %s30_s27 }
  0x16   :  { %p287_p9 = scmp.lt.u32.totalorder %s283_s30, %s440_s1 }
  0x18   :  { %p289_p10 = pnand %p287_p9, %p284_p8 }
  0x1a   :  { %292 = shalt.err (!%p289_p10)
}
  0x1b   :  { %s293_s8 = scalar_lea.vmem %s31_s27, 256  ;;  %p298_p12 = scmp.lt.s32.totalorder %s31_s27, %s31_s27 }
  0x1c   :  { %p294_p11 = scmp.ne.s32.totalorder %s31_s27, %s293_s8  ;;  %p299_p13 = scmp.lt.s32.totalorder %s293_s8, %s293_s8 }
  0x1e   :  { %p300_p0 = por %p299_p13, %p298_p12 }
  0x20   :  { %p301_p1 = pnand %p300_p0, %p294_p11 }
  0x22   :  { %304 = shalt.err (!%p301_p1)
}
  0x23   :  { %36 = dma.hbm_to_vmem [thread:$0]  %s440_s1, 256, %s31_s27, [#allocation6], %s358_s22, %s358_s22, %s359_s23  }
  0x24   :  { %349 = dma.done.wait [#allocation3], 256  }
  0x25   :  { %350 = vsyncadd [#allocation3], 4294967040 }
  0x26   :  { %351 = dma.done.wait [#allocation6], 256  }
  0x27   :  { %352 = vsyncadd [#allocation6], 4294967040  ;;  %v241_v0 = vld [vmem:[#allocation5] sm:$0xff]   ;;  %v242_v1 = vld [vmem:[#allocation5 + $0x8] sm:$0xff]   ;;  %vm74_vm0 = vcmask 261120   ;;  %v134_v4 = vlaneseq  ;;  %s361_s1 = smov [#allocation7]  }
  0x28   :  { %225 = vmatprep.subr.bf16.mxu0 %v241_v0  ;;  %v243_v2 = vld [vmem:[#allocation2] sm:$0xff]   ;;  %v244_v3 = vld [vmem:[#allocation2 + $0x8] sm:$0xff]   ;;  %s186_s10 = sshll.u32 %s361_s1, 4  ;;  %s187_s10 = int_to_ptr.vmem [resolvable:$true] %s186_s10 }
  0x29   :  { %226 = vmatpush3.bf16.msra.mxu0 %v241_v0  ;;  %229 = vmatprep.mubr.msk.bf16.mxu0 %vm74_vm0, %v243_v2  ;;  %v135_v5 = vand.u32 127, %v134_v4  ;;  %s305_s11 = scalar_lea.vmem %s187_s10, 512  ;;  %p310_p3 = scmp.lt.s32.totalorder %s187_s10, %s187_s10 }
  0x2a   :  { %227 = vmatprep.subr.bf16.mxu0 %v242_v1  ;;  %p306_p2 = scmp.ne.s32.totalorder %s187_s10, %s305_s11  ;;  %p311_p4 = scmp.lt.s32.totalorder %s305_s11, %s305_s11 }
  0x2b   :  { %vm136_vm1 = vcmp.lt.s32.totalorder %v135_v5, 6 }
  0x2c   :  { %p312_p5 = por %p311_p4, %p310_p3 }
  0x2d   :  { %228 = vmatpush3.bf16.msra.mxu0 %v242_v1 }
  0x2e   :  { %p313_p6 = pnand %p312_p5, %p306_p2 }
  0x30   :  { %230 = vmatmul.mubr.msk.bf16.vlgmr.msra.gmra.mrb[0].mxu0 %vm74_vm0, %v244_v3 }
 0x103   :  { %v231_v6 = vpop.f32.mrb[0].mxu0 }
 0x104   :  { %132 = vst [vmem:[#allocation7 + $0x10] sm:$0xff] %v231_v6  ;;  %v115_v7 = vpop.f32.mrb[1].mxu0  ;;  %v139_v8 = vsel %vm136_vm1, %v231_v6, -inf }
 0x105   :  { %130 = vst [vmem:[#allocation7] sm:$0xff] %v115_v7  ;;  %145 = vmax.xlane.f32.xlu1 %v139_v8  ;;  %v232_v9 = vpop.f32.mrb[2].mxu0  ;;  %v137_v10 = vsel %vm136_vm1, %v115_v7, -inf }
 0x106   :  { %133 = vst [vmem:[#allocation7 + $0x18] sm:$0xff] %v232_v9  ;;  %141 = vmax.xlane.f32.xlu0 %v137_v10  ;;  %v118_v11 = vpop.f32.mrb[3].mxu0  ;;  %v140_v12 = vsel %vm136_vm1, %v232_v9, -inf }
 0x107   :  { %131 = vst [vmem:[#allocation7 + $0x8] sm:$0xff] %v118_v11  ;;  %v138_v13 = vsel %vm136_vm1, %v118_v11, -inf }
 0x109   :  { %147 = vmax.xlane.f32.xlu1 %v140_v12 }
 0x10a   :  { %143 = vmax.xlane.f32.xlu0 %v138_v13 }
 0x192   :  { %v146_v14 = vpop.xlane.xlu1 %145 }
 0x193   :  { %v151_v15 = vsub.f32 %v139_v8, %v146_v14  ;;  %v142_v16 = vpop.xlane.xlu0 %141 }
 0x194   :  { %v149_v17 = vsub.f32 %v137_v10, %v142_v16 }
 0x195   :  { %v157_v20 = vmul.f32 1.442695, %v151_v15 }
 0x196   :  { %v153_v18 = vmul.f32 1.442695, %v149_v17  ;;  %v148_v19 = vpop.xlane.xlu1 %147 }
 0x197   :  { %v144_v21 = vpop.xlane.xlu0 %143  ;;  %v152_v22 = vsub.f32 %v140_v12, %v148_v19 }
 0x198   :  { %245 = vpow2.f32 %v153_v18  ;;  %v150_v23 = vsub.f32 %v138_v13, %v144_v21 }
 0x199   :  { %247 = vpow2.f32 %v157_v20  ;;  %v159_v25 = vmul.f32 1.442695, %v152_v22 }
 0x19a   :  { %v155_v24 = vmul.f32 1.442695, %v150_v23 }
 0x19c   :  { %249 = vpow2.f32 %v155_v24 }
 0x19d   :  { %251 = vpow2.f32 %v159_v25 }
 0x1a2   :  { %v246_v26 = vpop.eup %245 }
 0x1a3   :  { %161 = vadd.xlane.f32.xlu0 %v246_v26  ;;  %v248_v27 = vpop.eup %247 }
 0x1a6   :  { %v250_v28 = vpop.eup %249 }
 0x1a7   :  { %165 = vadd.xlane.f32.xlu0 %v248_v27  ;;  %163 = vadd.xlane.f32.xlu1 %v250_v28  ;;  %v252_v29 = vpop.eup %251 }
 0x1ab   :  { %167 = vadd.xlane.f32.xlu1 %v252_v29 }
 0x1ac   :  { %316 = shalt.err (!%p313_p6)
}
 0x1ad   :  { %s317_s14 = scalar_lea.hbm %s441_s2, 512 }
 0x1ae   :  { %p318_p7 = scmp.ne.s32.totalorder %s441_s2, %s317_s14  ;;  %p321_p8 = scmp.lt.u32.totalorder %s317_s14, %s441_s2 }
 0x1b0   :  { %p323_p9 = pnand %p321_p8, %p318_p7 }
 0x1b2   :  { %326 = shalt.err (!%p323_p9)
}
 0x1b3   :  { %s362_s19 = smov 128   ;;  %s363_s20 = smov 8  }
 0x1b4   :  { %192 = dma.vmem_to_hbm [thread:$0]  %s187_s10, 512, %s441_s2, [#allocation4], %s362_s19, %s362_s19, %s363_s20  }
 0x1b5   :  { %s364_s23 = smov [#allocation8]  }
 0x1b6   :  { %s198_s24 = sshll.u32 %s364_s23, 4  ;;  %s199_s24 = int_to_ptr.vmem [resolvable:$true] %s198_s24 }
 0x1b7   :  { %s327_s2 = scalar_lea.vmem %s199_s24, 512  ;;  %p332_p11 = scmp.lt.s32.totalorder %s199_s24, %s199_s24 }
 0x1b8   :  { %p328_p10 = scmp.ne.s32.totalorder %s199_s24, %s327_s2  ;;  %p333_p12 = scmp.lt.s32.totalorder %s327_s2, %s327_s2 }
 0x1ba   :  { %p334_p13 = por %p333_p12, %p332_p11 }
 0x1bc   :  { %p335_p0 = pnand %p334_p13, %p328_p10 }
 0x230   :  { %v162_v30 = vpop.xlane.xlu0 %161 }
 0x231   :  { %253 = vrcp.f32 %v162_v30 }
 0x234   :  { %v164_v31 = vpop.xlane.xlu1 %163  ;;  %v166_v32 = vpop.xlane.xlu0 %165 }
 0x235   :  { %255 = vrcp.f32 %v164_v31 }
 0x236   :  { %257 = vrcp.f32 %v166_v32 }
 0x238   :  { %v168_v33 = vpop.xlane.xlu1 %167 }
 0x239   :  { %259 = vrcp.f32 %v168_v33 }
 0x23b   :  { %v254_v34 = vpop.eup %253 }
 0x23c   :  { %v170_v35 = vmul.f32 %v254_v34, %v246_v26 }
 0x23e   :  { %177 = vst [vmem:[#allocation8] sm:$0xff] %v170_v35 }
 0x23f   :  { %v256_v36 = vpop.eup %255 }
 0x240   :  { %v258_v37 = vpop.eup %257  ;;  %v172_v38 = vmul.f32 %v256_v36, %v250_v28 }
 0x241   :  { %v174_v39 = vmul.f32 %v258_v37, %v248_v27 }
 0x242   :  { %178 = vst [vmem:[#allocation8 + $0x8] sm:$0xff] %v172_v38 }
 0x243   :  { %v260_v40 = vpop.eup %259  ;;  %179 = vst [vmem:[#allocation8 + $0x10] sm:$0xff] %v174_v39 }
 0x244   :  { %v176_v41 = vmul.f32 %v260_v40, %v252_v29 }
 0x246   :  { %180 = vst [vmem:[#allocation8 + $0x18] sm:$0xff] %v176_v41 }
 0x247   :  { %338 = shalt.err (!%p335_p0)
}
 0x248   :  { %s339_s27 = scalar_lea.hbm %s442_s3, 512 }
 0x249   :  { %p340_p1 = scmp.ne.s32.totalorder %s442_s3, %s339_s27  ;;  %p343_p2 = scmp.lt.u32.totalorder %s339_s27, %s442_s3 }
 0x24b   :  { %p345_p3 = pnand %p343_p2, %p340_p1 }
 0x24d   :  { %348 = shalt.err (!%p345_p3)
}
 0x24e   :  { %204 = dma.vmem_to_hbm [thread:$0]  %s199_s24, 512, %s442_s3, [#allocation9], %s362_s19, %s362_s19, %s363_s20  }
 0x24f   :  { %353 = dma.done.wait [#allocation4], 512  }
 0x250   :  { %354 = vsyncadd [#allocation4], 4294966784 }
 0x251   :  { %355 = dma.done.wait [#allocation9], 512  }
 0x252   :  { %356 = vsyncadd [#allocation9], 4294966784 }
 0x253   :  { %211 = vsyncpa [#allocation3], 1 }
 0x254   :  { %212 = vsyncpa [#allocation6], 1 }
 0x255   :  { %213 = vsyncpa [#allocation4], 1 }
 0x256   :  { %214 = vsyncpa [#allocation9], 1 }

// kernel: pamoe_forward.5
= control target key start
LH: loop header
LB: loop body
LE: loop exit
PB: predicated region body
PF: predicated region fallthrough
CT: control target
= control target key end

     0   :  { %s1074_s0 = inlined_call_operand.hbm [shape: s32[2,1,12], index: 0, kind: input, shape index: {}]   ;;  %s1075_s1 = inlined_call_operand.hbm [shape: f32[2,1,12], index: 1, kind: input, shape index: {}]   ;;  %s1076_s2 = inlined_call_operand.hbm [shape: bf16[2,12,32], index: 2, kind: input, shape index: {}]   ;;  %s1077_s3 = inlined_call_operand.hbm [shape: f32[2,16,32], index: 3, kind: output, shape index: {}]  }
   0x1   :  { %1080 = sst [smem:[#allocation12_spill]] %s1075_s1 }
   0x2   :  { %8 = vsyncpa [#allocation3], 0 }
   0x3   :  { %10 = vsyncpa [#allocation3 + $0x1], 0 }
   0x4   :  { %11 = vsyncpa [#allocation6], 0 }
   0x5   :  { %13 = vsyncpa [#allocation6 + $0x1], 0 }
   0x6   :  { %14 = vsyncpa [#allocation4], 0 }
   0x7   :  { %16 = vsyncpa [#allocation4 + $0x1], 0  ;;  %s808_s12 = smov 0   ;;  %s810_s13 = smov 0  }
   0x8   :  { %s812_s14 = smov 0   ;;  %s814_s15 = smov 0  }
   0x9   :  { %s816_s16 = smov 0   ;;  %s818_s17 = smov 0  }
   0xa LB: > { %s839_s18 = sadd.s32 4294967295, %s776_s17   ;;  %s491_s19 = sadd.s32 4294967294, %s776_s17   ;;  %s776_s17 = sphi %s818_s17, %s22_s17   ;;  %s772_s16 = sphi %s816_s16, %s1099_s16   ;;  %s768_s15 = sphi %s814_s15, %s1098_s15   ;;  %s764_s14 = sphi %s812_s14, %s1097_s14   ;;  %s760_s13 = sphi %s810_s13, %s1096_s13   ;;  %s756_s12 = sphi %s808_s12, %s1095_s12  }
   0xb   : > { %s34_s20 = sadd.s32 1, %s772_s16  ;;  %s41_s21 = sadd.s32 1, %s764_s14 }
   0xc   : > { %p36_p0 = scmp.ge.s32.totalorder %s34_s20, 2  ;;  %p48_p1 = scmp.ne.s32.totalorder %s764_s14, %s760_s13 }
   0xd   : > { %p49_p2 = scmp.eq.s32.totalorder %s776_s17, 0  ;;  %p54_p3 = scmp.ne.s32.totalorder %s760_s13, %s756_s12 }
   0xe   : > { %s1101_s20 = smov (%p36_p0, %s34_s20), 0  ;;  %p55_p5 = scmp.eq.s32.totalorder %s839_s18, 0 }
   0xf   : > { %p851_p4 = por %p49_p2, %p48_p1  ;;  %s38_s23 = ssub.s32 %s772_s16, %s1101_s20 }
  0x10   : > { %p132_p6 = scmp.eq.s32.totalorder %s839_s18, 1  ;;  %p39_p7 = scmp.eq.s32.totalorder %s38_s23, 0 }
  0x11   : > { %p859_p8 = por %p55_p5, %p54_p3  ;;  %p138_p10 = scmp.eq.s32.totalorder %s491_s19, 1 }
  0x12   : > { %p863_p9 = por %p132_p6, %p48_p1  ;;  %p543_p13 = scmp.lt.s32.totalorder %s776_s17, 2 }
  0x13   : > { %s1082_s24 = scalar_select %p859_p8, 1, 0 }
  0x14   : > { %s1083_s25 = scalar_select %p863_p9, 1, 0 }
  0x15   : > { %s868_s26 = scalar_select %p39_p7, %s764_s14, %s41_s21  }
  0x16   : > { %p870_p11 = por %p138_p10, %p54_p3  ;;  %s877_s28 = sand.u32 1, %s764_s14  }
  0x17   : > { %s494_s29 = sshll.u32 %s772_s16, 4  ;;  %s175_s30 = sand.u32 1, %s776_s17  }
  0x18   : > { %s1084_s27 = scalar_select %p870_p11, 1, 0 }
  0x19   : > { %p883_p0 = pnand %p543_p13, %p851_p4  ;;  %s1086_s1 = sld [smem:[#allocation12_spill]] }
  0x1a   : > { %s178_s8 = scalar_lea.vmem [#allocation5], %s877_s28  ;;  %s898_s11 = scalar_lea.sflag [#allocation6], %s175_s30 }
  0x1b   : > { %s185_s9 = sshll.u32 %s178_s8, 4  ;;  %p904_p2 = pneg %p883_p0  ;;  %s895_s9 = int_to_ptr.vmem [resolvable:$true] %s185_s9 }
  0x1f   : > { %s892_s7 = scalar_lea.hbm %s1086_s1, %s494_s29  ;;  %s605_s5 = scalar_lea.hbm %s1086_s1, 32 }
  0x20   : > { %s600_s19 = scalar_lea.hbm %s892_s7, 16  ;;  %p606_p5 = scmp.lt.u32.totalorder %s892_s7, %s1086_s1 }
  0x21   : > { %p601_p1 = scmp.ne.s32.totalorder %s892_s7, %s600_s19  ;;  %p607_p6 = scmp.lt.u32.totalorder %s605_s5, %s600_s19 }
  0x22   : > { %p609_p10 = scmp.lt.u32.totalorder %s600_s19, %s892_s7 }
  0x23   : > { %p603_p3 = pnand %p904_p2, %p601_p1  ;;  %p608_p7 = por %p607_p6, %p606_p5 }
  0x25   : > { %p604_p4 = pneg %p603_p3  ;;  %p610_p13 = por %p609_p10, %p608_p7 }
  0x27   : > { %p611_p12 = pnand %p610_p13, %p604_p4 }
  0x29   : > { %614 = shalt.err (!%p611_p12)
}
  0x2a   : > { %s615_s30 = scalar_lea.vmem %s895_s9, 16  ;;  %s778_s22 = smov [#allocation5]  }
  0x2b   : > { %p616_p1 = scmp.ne.s32.totalorder %s895_s9, %s615_s30  ;;  %s620_s23 = sshll.u32 %s778_s22, 4  ;;  %s621_s23 = int_to_ptr.vmem [resolvable:$false] %s620_s23 }
  0x2c   : > { %s622_s6 = scalar_lea.vmem %s621_s23, 32  ;;  %p623_p9 = scmp.lt.s32.totalorder %s895_s9, %s621_s23 }
  0x2d   : > { %p618_p3 = pnand %p616_p1, %p904_p2  ;;  %p624_p8 = scmp.lt.s32.totalorder %s622_s6, %s615_s30 }
  0x2f   : > { %p619_p11 = pneg %p618_p3  ;;  %p625_p5 = por %p624_p8, %p623_p9 }
  0x31   : > { %p626_p6 = pnand %p625_p5, %p619_p11 }
  0x33   : > { %629 = shalt.err (!%p626_p6)
}
  0x34   : > { %535 = dma.hbm_to_vmem [thread:$0]  (!%p883_p0), %s892_s7, 16, %s895_s9, %s898_s11  }
  0x35   : > { %p499_p12 = scmp.ge.s32.totalorder %s776_s17, 1  ;;  %p211_p4 = scmp.lt.s32.totalorder %s776_s17, 3 }
  0x36   : > { %s939_s30 = scalar_lea.hbm %s1074_s0, %s494_s29  ;;  %s161_s22 = scalar_lea.vmem [#allocation2], %s877_s28 }
  0x37   : > { %p930_p7 = pnand %p499_p12, %p211_p4  ;;  %s168_s23 = sshll.u32 %s161_s22, 4  ;;  %s942_s23 = int_to_ptr.vmem [resolvable:$true] %s168_s23 }
  0x38   : > { %s511_s7 = sshll.u32 %s772_s16, 7  ;;  %s159_s9 = scalar_lea.sflag [#allocation3], %s877_s28 }
  0x39   : > { %s1088_s19 = scalar_select %p930_p7, 1, 0 }
  0x3a   : > { %s630_s6 = scalar_lea.hbm %s939_s30, 16  ;;  %s635_s29 = scalar_lea.hbm %s1074_s0, 32 }
  0x3b   : > { %p631_p8 = scmp.ne.s32.totalorder %s939_s30, %s630_s6  ;;  %p636_p10 = scmp.lt.u32.totalorder %s939_s30, %s1074_s0 }
  0x3c   : > { %p637_p13 = scmp.lt.u32.totalorder %s635_s29, %s630_s6  ;;  %p639_p3 = scmp.lt.u32.totalorder %s630_s6, %s939_s30 }
  0x3d   : > { %p633_p9 = pnand %p631_p8, %p904_p2 }
  0x3e   : > { %p638_p1 = por %p637_p13, %p636_p10 }
  0x3f   : > { %p634_p11 = pneg %p633_p9 }
  0x40   : > { %p640_p5 = por %p639_p3, %p638_p1 }
  0x42   : > { %p641_p6 = pnand %p640_p5, %p634_p11 }
  0x44   : > { %644 = shalt.err (!%p641_p6)
}
  0x45   : > { %s645_s22 = scalar_lea.vmem %s942_s23, 16  ;;  %s779_s1 = smov [#allocation2]  }
  0x46   : > { %p646_p12 = scmp.ne.s32.totalorder %s942_s23, %s645_s22  ;;  %s650_s10 = sshll.u32 %s779_s1, 4  ;;  %s651_s10 = int_to_ptr.vmem [resolvable:$false] %s650_s10 }
  0x47   : > { %s652_s5 = scalar_lea.vmem %s651_s10, 32  ;;  %p653_p9 = scmp.lt.s32.totalorder %s942_s23, %s651_s10 }
  0x48   : > { %p648_p4 = pnand %p646_p12, %p904_p2  ;;  %p654_p7 = scmp.lt.s32.totalorder %s652_s5, %s645_s22 }
  0x4a   : > { %p649_p8 = pneg %p648_p4  ;;  %p655_p10 = por %p654_p7, %p653_p9 }
  0x4c   : > { %p656_p13 = pnand %p655_p10, %p649_p8 }
  0x4e   : > { %659 = shalt.err (!%p656_p13)
}
  0x4f   : > { %532 = dma.hbm_to_vmem [thread:$0]  (!%p883_p0), %s939_s30, 16, %s942_s23, %s159_s9  }
  0x50   : > { %s972_s8 = scalar_lea.hbm %s1076_s2, %s511_s7  ;;  %s1089_s1 = sshll.u32 %s877_s28, 3 }
  0x51   : > { %s196_s22 = scalar_lea.vmem [#allocation7], %s1089_s1  ;;  %s660_s5 = scalar_lea.hbm %s972_s8, 128 }
  0x52   : > { %s203_s10 = sshll.u32 %s196_s22, 4  ;;  %p661_p7 = scmp.ne.s32.totalorder %s972_s8, %s660_s5  ;;  %s976_s10 = int_to_ptr.vmem [resolvable:$true] %s203_s10 }
  0x53   : > { %s665_s9 = scalar_lea.hbm %s1076_s2, 256  ;;  %p666_p3 = scmp.lt.u32.totalorder %s972_s8, %s1076_s2 }
  0x54   : > { %p663_p11 = pnand %p661_p7, %p904_p2  ;;  %p667_p5 = scmp.lt.u32.totalorder %s665_s9, %s660_s5 }
  0x55   : > { %p669_p12 = scmp.lt.u32.totalorder %s660_s5, %s972_s8 }
  0x56   : > { %p664_p1 = pneg %p663_p11  ;;  %p668_p6 = por %p667_p5, %p666_p3 }
  0x58   : > { %p670_p4 = por %p669_p12, %p668_p6 }
  0x5a   : > { %p671_p8 = pnand %p670_p4, %p664_p1 }
  0x5c   : > { %674 = shalt.err (!%p671_p8)
}
  0x5d   : > { %s675_s28 = scalar_lea.vmem %s976_s10, 128  ;;  %s780_s29 = smov [#allocation7]  }
  0x5e   : > { %p676_p9 = scmp.ne.s32.totalorder %s976_s10, %s675_s28  ;;  %s680_s1 = sshll.u32 %s780_s29, 4  ;;  %s681_s1 = int_to_ptr.vmem [resolvable:$false] %s680_s1 }
  0x5f   : > { %s682_s22 = scalar_lea.vmem %s681_s1, 256  ;;  %p683_p7 = scmp.lt.s32.totalorder %s976_s10, %s681_s1 }
  0x60   : > { %p678_p10 = pnand %p676_p9, %p904_p2  ;;  %p684_p11 = scmp.lt.s32.totalorder %s682_s22, %s675_s28 }
  0x62   : > { %p679_p13 = pneg %p678_p10  ;;  %p685_p3 = por %p684_p11, %p683_p7 }
  0x64   : > { %p686_p5 = pnand %p685_p3, %p679_p13 }
  0x66   : > { %689 = shalt.err (!%p686_p5)
}
  0x67   : > { %s781_s5 = smov 64   ;;  %s782_s30 = smov 4  }
  0x68   : > { %538 = dma.hbm_to_vmem [thread:$0]  (!%p883_p0), %s972_s8, 128, %s976_s10, %s898_s11, %s781_s5, %s781_s5, %s782_s30  }
  0x69   : > { %p1090_p2 = scmp.ne.s32.totalorder %s1088_s19, 0 }
  0x6a   : > { %s1003_s21 = sand.u32 (!%p1090_p2), 1, %s760_s13   ;;  %p1091_p1 = scmp.ne.s32.totalorder (!%p1090_p2), %s1082_s24, 0 }
  0x6b   : > { %215 = sbr.rel (%p1090_p2) target bundleno = 357 (0x165), region = 32  ;;  %s218_s23 = scalar_lea.sflag (!%p1090_p2), [#allocation3], %s1003_s21 }
  0x6c   : > { %s220_s9 = scalar_lea.vmem (!%p1090_p2), [#allocation2], %s1003_s21 }
  0x72   : > { %743 = dma.done.wait (%p1091_p1), %s218_s23, 16  }
  0x73   : > { %745 = vsyncadd (%p1091_p1), %s218_s23, 4294967280  ;;  %s225_s4 = sand.u32 1, %s839_s18   ;;  %s228_s19 = scalar_lea.vmem [#allocation5], %s1003_s21 }
  0x74   : > { %s226_s11 = scalar_lea.sflag [#allocation6], %s225_s4 }
  0x75   : > { %747 = dma.done.wait (%p1091_p1), %s226_s11, 144  }
  0x76   : > { %749 = vsyncadd (%p1091_p1), %s226_s11, 4294967152  ;;  %v271_v0 = vlaneseq  ;;  %v783_v1 = vmov 0.0   ;;  %s500_s8 = sshll.u32 %s1003_s21, 3  ;;  %vm784_vm0 = vmmov 0   ;;  %vm305_vm1 = vcmask 1045504   ;;  %s501_s18 = sshll.u32 %s1003_s21, 4 }
  0x77   : > { %515 = vmatprep.subr.bf16.mxu0 %v783_v1  ;;  %517 = vmatprep.mubr.msk.bf16.mxu0 %vm784_vm0, %v783_v1  ;;  %s237_s10 = scalar_lea.vmem [#allocation7], %s500_s8  ;;  %v502_v5 = vld [vmem:[%s220_s9] ss:$0 sm:$0xff]  ;;  %vm301_vm4 = vcmask 97280   ;;  %s267_s24 = scalar_lea.vmem [#allocation8], %s501_s18  ;;  %vm350_vm5 = vcmask 261120  }
  0x78   : > { %v272_v2 = vshrl.u32 %v271_v0, 7  ;;  %v599_v4 = vld [vmem:[%s237_s10] sm:$0x3f]   ;;  %v503_v6 = vld [vmem:[%s228_s19] ss:$0 sm:$0xff]  ;;  %s369_s7 = sshll.u32 %s267_s24, 4  ;;  %s1020_s7 = int_to_ptr.vmem [resolvable:$true] %s369_s7 }
  0x79   : > { %v307_v7 = vsel %vm305_vm1, %v599_v4, 0  ;;  %s512_s6 = sshll.u32 %s768_s15, 8  ;;  %s354_s22 = scalar_lea.sflag [#allocation4], %s1003_s21 }
  0x7a   : > { %v273_v3 = vadd.s32 8, %v272_v2  ;;  %vm282_vm2 = vcmp.eq.s32.totalorder %v272_v2, %v502_v5  ;;  %516 = vmatpush3.bf16.msra.mxu0 %v307_v7  ;;  %s1025_s1 = scalar_lea.hbm %s1077_s3, %s512_s6  ;;  %s690_s5 = scalar_lea.vmem %s1020_s7, 256 }
  0x7b   : > { %v291_v8 = vsel %vm282_vm2, %v503_v6, 0.0  ;;  %p691_p0 = scmp.ne.s32.totalorder %s1020_s7, %s690_s5  ;;  %p1092_p6 = scmp.ne.s32.totalorder %s1083_s25, 0 }
  0x7c   : > { %vm283_vm3 = vcmp.eq.s32.totalorder %v273_v3, %v502_v5  ;;  %s785_s15 = smov [#allocation8]  }
  0x7d   : > { %v292_v9 = vsel %vm283_vm3, %v503_v6, 0.0  ;;  %p692_p12 = pnand %p691_p0, %p1092_p6  ;;  %s694_s30 = sshll.u32 %s785_s15, 4  ;;  %s695_s30 = int_to_ptr.vmem [resolvable:$false] %s694_s30 }
  0x7e   : > { %v293_v10 = vpack.c.bf16 %v292_v9, %v291_v8  ;;  %s696_s23 = scalar_lea.vmem %s695_s30, 512  ;;  %p697_p8 = scmp.lt.s32.totalorder %s1020_s7, %s695_s30 }
  0x7f   : > { %p693_p4 = pneg %p692_p12  ;;  %p698_p9 = scmp.lt.s32.totalorder %s696_s23, %s690_s5 }
  0x80   : > { %518 = vmatmul.mubr.msk.bf16.vlgmr.msra.gmra.mrb[0].mxu0 %vm301_vm4, %v293_v10 }
  0x81   : > { %p699_p10 = por %p698_p9, %p697_p8 }
  0x83   : > { %p700_p13 = pnand %p699_p10, %p693_p4 }
 0x153   : > { %v343_v11 = vpop.f32.mrb[0].mxu0 }
 0x154   : > { %351 = vst.msk [vmem:[%s267_s24] sm:$0xff] %vm350_vm5, %v343_v11  ;;  %v519_v12 = vpop.f32.mrb[1].mxu0 }
 0x155   : > { %v346_v13 = vpop.f32.mrb[2].mxu0 }
 0x156   : > { %352 = vst.msk [vmem:[%s267_s24 + $0x8] sm:$0xff] %vm350_vm5, %v346_v13  ;;  %v520_v14 = vpop.f32.mrb[3].mxu0 }
 0x157   : > { %703 = shalt.err (!%p700_p13)
}
 0x158   : > { %s704_s9 = scalar_lea.hbm %s1025_s1, 256  ;;  %s708_s19 = scalar_lea.hbm %s1077_s3, 512 }
 0x159   : > { %p705_p7 = scmp.ne.s32.totalorder %s1025_s1, %s704_s9  ;;  %p709_p5 = scmp.lt.u32.totalorder %s1025_s1, %s1077_s3 }
 0x15a   : > { %p710_p2 = scmp.lt.u32.totalorder %s708_s19, %s704_s9  ;;  %p712_p0 = scmp.lt.u32.totalorder %s704_s9, %s1025_s1 }
 0x15b   : > { %p706_p11 = pnand %p705_p7, %p1092_p6 }
 0x15c   : > { %p711_p1 = por %p710_p2, %p709_p5 }
 0x15d   : > { %p707_p3 = pneg %p706_p11 }
 0x15e   : > { %p713_p12 = por %p712_p0, %p711_p1 }
 0x160   : > { %p714_p4 = pnand %p713_p12, %p707_p3 }
 0x162   : > { %717 = shalt.err (!%p714_p4)
}
 0x163   : > { %s786_s18 = smov 128   ;;  %s787_s24 = smov 8  }
 0x164   : > { %527 = dma.vmem_to_hbm [thread:$0]  (%p1092_p6), %s1020_s7, 256, %s1025_s1, %s354_s22, %s786_s18, %s786_s18, %s787_s24  }
 0x165 PF: > { %s384_s6 = sand.u32 1, %s756_s12   ;;  %p1093_p8 = scmp.ne.s32.totalorder %s1084_s27, 0 }
 0x166   : > { %p1094_p9 = scmp.ge.s32.totalorder %s776_s17, 2  ;;  %s385_s28 = scalar_lea.sflag [#allocation4], %s384_s6 }
 0x168   : > { %p540_p10 = pnand %p1094_p9, %p1093_p8 }
 0x16a   : > { %751 = dma.done.wait (!%p540_p10), %s385_s28, 256  }
 0x16b   : > { %753 = vsyncadd (!%p540_p10), %s385_s28, 4294967040  ;;  %s22_s17 = sadd.s32 1, %s776_s17   ;;  %s1095_s12 = smov %s760_s13 }
 0x16c   : > { %p19_p13 = scmp.ge.s32.totalorder %s22_s17, 4   ;;  %s1096_s13 = smov %s764_s14 }
 0x16d   : > { %s1097_s14 = smov %s868_s26  ;;  %s1098_s15 = smov %s772_s16 }
 0x16e   : > { %s1099_s16 = smov %s1101_s20  ;;  %21 = sbr.rel (!%p19_p13) target bundleno = 10 (0xa), region = 101 }
 0x175   :  { %390 = vsyncpa [#allocation3], 1 }
 0x176   :  { %392 = vsyncpa [#allocation3 + $0x1], 1 }
 0x177   :  { %393 = vsyncpa [#allocation6], 1 }
 0x178   :  { %395 = vsyncpa [#allocation6 + $0x1], 1 }
 0x179   :  { %396 = vsyncpa [#allocation4], 1 }
 0x17a   :  { %398 = vsyncpa [#allocation4 + $0x1], 1 }

// kernel: pamoe_forward.4
= control target key start
LH: loop header
LB: loop body
LE: loop exit
PB: predicated region body
PF: predicated region fallthrough
CT: control target
= control target key end

     0   :  { %s2053_s0 = inlined_call_operand.hbm [shape: bf16[6,2,2,32], index: 0, kind: input, shape index: {}]   ;;  %s2054_s1 = inlined_call_operand.hbm [shape: bf16[6,32,64], index: 1, kind: input, shape index: {}]   ;;  %s2055_s2 = inlined_call_operand.hbm [shape: f32[6,1,64], index: 2, kind: input, shape index: {}]   ;;  %s2056_s3 = inlined_call_operand.hbm [shape: f32[6,1,64], index: 3, kind: input, shape index: {}]   ;;  %s2057_s4 = inlined_call_operand.hbm [shape: f32[6,1,64], index: 4, kind: input, shape index: {}]   ;;  %s2058_s5 = inlined_call_operand.hbm [shape: bf16[6,64,32], index: 5, kind: input, shape index: {}]   ;;  %s2059_s6 = inlined_call_operand.hbm [shape: f32[6,1,32], index: 6, kind: input, shape index: {}]   ;;  %s2060_s7 = inlined_call_operand.hbm [shape: bf16[2,6,2,32], index: 7, kind: output, shape index: {}]  }
   0x1   :  { %2086 = sst [smem:[#allocation32_spill]] %s2054_s1 }
   0x2   :  { %2087 = sst [smem:[#allocation33_spill]] %s2056_s3 }
   0x3   :  { %2088 = sst [smem:[#allocation34_spill]] %s2058_s5 }
   0x4   :  { %2089 = sst [smem:[#allocation35_spill]] %s2060_s7 }
   0x5   :  { %12 = vsyncpa [#allocation3], 0 }
   0x6   :  { %14 = vsyncpa [#allocation3 + $0x1], 0 }
   0x7   :  { %15 = vsyncpa [#allocation6], 0 }
   0x8   :  { %17 = vsyncpa [#allocation6 + $0x1], 0 }
   0x9   :  { %18 = vsyncpa [#allocation9], 0 }
   0xa   :  { %20 = vsyncpa [#allocation9 + $0x1], 0 }
   0xb   :  { %21 = vsyncpa [#allocation12], 0 }
   0xc   :  { %23 = vsyncpa [#allocation12 + $0x1], 0 }
   0xd   :  { %24 = vsyncpa [#allocation4], 0 }
   0xe   :  { %26 = vsyncpa [#allocation4 + $0x1], 0  ;;  %s1553_s24 = smov 0   ;;  %s1555_s25 = smov 0  }
   0xf   :  { %s1557_s26 = smov 0   ;;  %s1559_s27 = smov 0  }
  0x10   :  { %s1561_s28 = smov 0   ;;  %s1563_s29 = smov 0  }
  0x11   :  { %s1565_s30 = smov 0   ;;  %s1567_s8 = smov 0  }
  0x12   :  { %s1569_s9 = smov 0   ;;  %s1571_s10 = smov 0  }
  0x13   :  { %s1573_s11 = smov 0  }
  0x14 LB: > { %2090 = sst [smem:[#allocation20_spill]] %s1462_s25  ;;  %p2063_p0 = scmp.eq.s32.totalorder %s1498_s11, 0  ;;  %s1498_s11 = sphi %s1573_s11, %s32_s11   ;;  %s1494_s10 = sphi %s1571_s10, %s2145_s10   ;;  %s1490_s9 = sphi %s1569_s9, %s2144_s9   ;;  %s1486_s8 = sphi %s1567_s8, %s2143_s8   ;;  %s1482_s30 = sphi %s1565_s30, %s2142_s30   ;;  %s1478_s29 = sphi %s1563_s29, %s2150_s29   ;;  %s1474_s28 = sphi %s1561_s28, %s2149_s28   ;;  %s1470_s27 = sphi %s1559_s27, %s2148_s27   ;;  %s1466_s26 = sphi %s1557_s26, %s2147_s26   ;;  %s1462_s25 = sphi %s1555_s25, %s2146_s25   ;;  %s1458_s24 = sphi %s1553_s24, %s2141_s24  }
  0x15   : > { %2091 = sst [smem:[#allocation21_spill]] %s1482_s30  ;;  %p86_p1 = scmp.ne.s32.totalorder %s1466_s26, %s1462_s25 }
  0x16   : > { %2092 = sst [smem:[#allocation22_spill]] %s1486_s8  ;;  %p2062_p2 = scmp.lt.s32.totalorder %s1498_s11, 12 }
  0x17   : > { %2093 = sst [smem:[#allocation23_spill]] %s1490_s9  ;;  %p88_p3 = por %p86_p1, %p2063_p0 }
  0x18   : > { %2094 = sst [smem:[#allocation24_spill]] %s1494_s10  ;;  %s1615_s12 = sand.u32 1, %s1498_s11  }
  0x19   : > { %s1618_s13 = sand.u32 1, %s1466_s26   ;;  %s974_s15 = sshll.u32 %s1494_s10, 8 }
  0x1a   : > { %s946_s14 = sshll.u32 %s1618_s13, 4  ;;  %s2095_s1 = sld [smem:[#allocation32_spill]] }
  0x1b   : > { %s297_s19 = scalar_lea.vmem [#allocation5], %s946_s14  ;;  %p1629_p4 = pnand %p2062_p2, %p88_p3 }
  0x1c   : > { %s304_s20 = sshll.u32 %s297_s19, 4  ;;  %s1633_s20 = int_to_ptr.vmem [resolvable:$true] %s304_s20 }
  0x1d   : > { %s2096_s21 = scalar_select %p1629_p4, 1, 0 }
  0x1e   : > { %p1640_p6 = pneg %p1629_p4 }
  0x20   : > { %s1625_s18 = scalar_lea.hbm %s2095_s1, %s974_s15  ;;  %s1159_s17 = scalar_lea.hbm %s2095_s1, 1536 }
  0x21   : > { %s1154_s23 = scalar_lea.hbm %s1625_s18, 256  ;;  %p1160_p9 = scmp.lt.u32.totalorder %s1625_s18, %s2095_s1 }
  0x22   : > { %p1155_p5 = scmp.ne.s32.totalorder %s1625_s18, %s1154_s23  ;;  %p1161_p10 = scmp.lt.u32.totalorder %s1159_s17, %s1154_s23 }
  0x23   : > { %p1163_p12 = scmp.lt.u32.totalorder %s1154_s23, %s1625_s18 }
  0x24   : > { %p1157_p7 = pnand %p1640_p6, %p1155_p5  ;;  %p1162_p11 = por %p1161_p10, %p1160_p9 }
  0x26   : > { %p1158_p8 = pneg %p1157_p7  ;;  %p1164_p13 = por %p1163_p12, %p1162_p11 }
  0x28   : > { %p1165_p1 = pnand %p1164_p13, %p1158_p8 }
  0x2a   : > { %1168 = shalt.err (!%p1165_p1)
}
  0x2b   : > { %s1169_s22 = scalar_lea.vmem %s1633_s20, 256  ;;  %s1500_s14 = smov [#allocation5]  }
  0x2c   : > { %p1170_p3 = scmp.ne.s32.totalorder %s1633_s20, %s1169_s22  ;;  %s1174_s16 = sshll.u32 %s1500_s14, 4  ;;  %s1175_s16 = int_to_ptr.vmem [resolvable:$false] %s1174_s16 }
  0x2d   : > { %s1176_s7 = scalar_lea.vmem %s1175_s16, 512  ;;  %p1177_p2 = scmp.lt.s32.totalorder %s1633_s20, %s1175_s16 }
  0x2e   : > { %p1172_p5 = pnand %p1170_p3, %p1640_p6  ;;  %p1178_p0 = scmp.lt.s32.totalorder %s1176_s7, %s1169_s22 }
  0x30   : > { %p1173_p7 = pneg %p1172_p5  ;;  %p1179_p9 = por %p1178_p0, %p1177_p2 }
  0x32   : > { %p1180_p10 = pnand %p1179_p9, %p1173_p7 }
  0x34   : > { %1183 = shalt.err (!%p1180_p10)
}
  0x35   : > { %s2064_s23 = smov 64   ;;  %s2065_s17 = smov 4  }
  0x36   : > { %s2098_s22 = scalar_lea.sflag [#allocation6], %s1615_s12  ;;  %p956_p0 = scmp.ge.s32.totalorder %s1498_s11, 1 }
  0x37   : > { %1027 = dma.hbm_to_vmem [thread:$0]  (!%p1629_p4), %s1625_s18, 256, %s1633_s20, %s2098_s22, %s2064_s23, %s2064_s23, %s2065_s17  }
  0x38   : > { %p401_p2 = scmp.lt.s32.totalorder %s1498_s11, 13  ;;  %s1671_s19 = sshll.u32 %s1494_s10, 4 }
  0x39   : > { %s2101_s3 = sld [smem:[#allocation33_spill]]  ;;  %s334_s8 = scalar_lea.vmem [#allocation8], %s1618_s13 }
  0x3a   : > { %p1673_p8 = pnand %p956_p0, %p401_p2  ;;  %s341_s18 = sshll.u32 %s334_s8, 4  ;;  %s342_s18 = int_to_ptr.vmem [resolvable:$true] %s341_s18 }
  0x3c   : > { %s2099_s14 = scalar_select %p1673_p8, 1, 0 }
  0x3e   : > { %2100 = sst [smem:[#allocation25_spill]] %s2099_s14 }
  0x3f   : > { %s1681_s1 = scalar_lea.hbm %s2101_s3, %s1671_s19  ;;  %s1189_s30 = scalar_lea.hbm %s2101_s3, 96 }
  0x40   : > { %s1184_s22 = scalar_lea.hbm %s1681_s1, 16  ;;  %p1190_p1 = scmp.lt.u32.totalorder %s1681_s1, %s2101_s3 }
  0x41   : > { %p1185_p11 = scmp.ne.s32.totalorder %s1681_s1, %s1184_s22  ;;  %p1191_p3 = scmp.lt.u32.totalorder %s1189_s30, %s1184_s22 }
  0x42   : > { %p1193_p7 = scmp.lt.u32.totalorder %s1184_s22, %s1681_s1 }
  0x43   : > { %p1187_p12 = pnand %p1185_p11, %p1640_p6  ;;  %p1192_p5 = por %p1191_p3, %p1190_p1 }
  0x45   : > { %p1188_p13 = pneg %p1187_p12  ;;  %p1194_p9 = por %p1193_p7, %p1192_p5 }
  0x47   : > { %p1195_p10 = pnand %p1194_p9, %p1188_p13 }
  0x49   : > { %1198 = shalt.err (!%p1195_p10)
}
  0x4a   : > { %s1199_s8 = scalar_lea.vmem %s342_s18, 16  ;;  %s1503_s20 = smov [#allocation8]  }
  0x4b   : > { %p1200_p0 = scmp.ne.s32.totalorder %s342_s18, %s1199_s8  ;;  %s1204_s14 = sshll.u32 %s1503_s20, 4  ;;  %s1205_s14 = int_to_ptr.vmem [resolvable:$false] %s1204_s14 }
  0x4c   : > { %s1206_s23 = scalar_lea.vmem %s1205_s14, 32  ;;  %p1207_p12 = scmp.lt.s32.totalorder %s342_s18, %s1205_s14 }
  0x4d   : > { %p1202_p2 = pnand %p1200_p0, %p1640_p6  ;;  %p1208_p8 = scmp.lt.s32.totalorder %s1206_s23, %s1199_s8 }
  0x4f   : > { %p1203_p11 = pneg %p1202_p2  ;;  %p1209_p4 = por %p1208_p8, %p1207_p12 }
  0x51   : > { %p1210_p1 = pnand %p1209_p4, %p1203_p11 }
  0x53   : > { %1213 = shalt.err (!%p1210_p1)
}
  0x54   : > { %p2102_p3 = scmp.ne.s32.totalorder %s2096_s21, 0  ;;  %s2103_s30 = scalar_lea.sflag [#allocation9], %s1615_s12 }
  0x55   : > { %s952_s17 = sshll.u32 %s1618_s13, 5  ;;  %s975_s22 = sshll.u32 %s1494_s10, 9 }
  0x56   : > { %1033 = dma.hbm_to_vmem [thread:$0]  (!%p2102_p3), %s1681_s1, 16, %s342_s18, %s2103_s30  }
  0x57   : > { %s2104_s5 = sld [smem:[#allocation34_spill]]  ;;  %s369_s7 = scalar_lea.vmem [#allocation11], %s952_s17 }
  0x58   : > { %s376_s8 = sshll.u32 %s369_s7, 4  ;;  %s2069_s23 = scalar_lea.sflag [#allocation12], %s1615_s12  ;;  %s1711_s8 = int_to_ptr.vmem [resolvable:$true] %s376_s8 }
  0x5d   : > { %s1709_s14 = scalar_lea.hbm %s2104_s5, %s975_s22  ;;  %s1219_s30 = scalar_lea.hbm %s2104_s5, 3072 }
  0x5e   : > { %s1214_s3 = scalar_lea.hbm %s1709_s14, 512  ;;  %p1220_p5 = scmp.lt.u32.totalorder %s1709_s14, %s2104_s5 }
  0x5f   : > { %p1215_p4 = scmp.ne.s32.totalorder %s1709_s14, %s1214_s3  ;;  %p1221_p7 = scmp.lt.u32.totalorder %s1219_s30, %s1214_s3 }
  0x60   : > { %p1223_p10 = scmp.lt.u32.totalorder %s1214_s3, %s1709_s14 }
  0x61   : > { %p1217_p8 = pnand %p1215_p4, %p1640_p6  ;;  %p1222_p9 = por %p1221_p7, %p1220_p5 }
  0x63   : > { %p1218_p13 = pneg %p1217_p8  ;;  %p1224_p0 = por %p1223_p10, %p1222_p9 }
  0x65   : > { %p1225_p2 = pnand %p1224_p0, %p1218_p13 }
  0x67   : > { %1228 = shalt.err (!%p1225_p2)
}
  0x68   : > { %s1229_s17 = scalar_lea.vmem %s1711_s8, 512  ;;  %s1504_s16 = smov [#allocation11]  }
  0x69   : > { %p1230_p11 = scmp.ne.s32.totalorder %s1711_s8, %s1229_s17  ;;  %s1234_s7 = sshll.u32 %s1504_s16, 4  ;;  %s1235_s7 = int_to_ptr.vmem [resolvable:$false] %s1234_s7 }
  0x6a   : > { %s1236_s1 = scalar_lea.vmem %s1235_s7, 1024  ;;  %p1237_p4 = scmp.lt.s32.totalorder %s1711_s8, %s1235_s7 }
  0x6b   : > { %p1232_p12 = pnand %p1230_p11, %p1640_p6  ;;  %p1238_p8 = scmp.lt.s32.totalorder %s1236_s1, %s1229_s17 }
  0x6d   : > { %p1233_p1 = pneg %p1232_p12  ;;  %p1239_p5 = por %p1238_p8, %p1237_p4 }
  0x6f   : > { %p1240_p7 = pnand %p1239_p5, %p1233_p1 }
  0x71   : > { %1243 = shalt.err (!%p1240_p7)
}
  0x72   : > { %s2105_s3 = smov 4   ;;  %s2106_s18 = smov 64  }
  0x73   : > { %1039 = dma.hbm_to_vmem [thread:$0]  (!%p2102_p3), %s1709_s14, 512, %s1711_s8, %s2069_s23, %s2106_s18, %s2106_s18, %s2105_s3  }
  0x74   : > { %s1741_s30 = sadd.s32 4294967295, %s1498_s11   ;;  %s941_s22 = sadd.s32 4294967294, %s1498_s11  }
  0x75   : > { %2107 = sst [smem:[#allocation26_spill]] %s1741_s30  ;;  %s41_s20 = sadd.s32 1, %s1490_s9 }
  0x76   : > { %s44_s17 = sadd.s32 1, %s1494_s10  ;;  %p42_p13 = scmp.ge.s32.totalorder %s41_s20, 2 }
  0x77   : > { %s53_s16 = sadd.s32 1, %s1478_s29  ;;  %p60_p9 = scmp.ne.s32.totalorder %s1478_s29, %s1474_s28 }
  0x78   : > { %p66_p10 = scmp.ne.s32.totalorder %s1474_s28, %s1470_s27  ;;  %s2152_s20 = smov (%p42_p13, %s41_s20), 0 }
  0x79   : > { %2108 = sst [smem:[#allocation27_spill]] %s2152_s20  ;;  %s2154_s17 = smov (!%p42_p13, %s44_s17), %s1494_s10 }
  0x7a   : > { %s49_s14 = ssub.s32 %s1490_s9, %s2152_s20  ;;  %p2109_p0 = scmp.eq.s32.totalorder %s1498_s11, 0 }
  0x7b   : > { %p46_p11 = scmp.ge.s32.totalorder %s2154_s17, 6  ;;  %p67_p12 = scmp.eq.s32.totalorder %s1741_s30, 0 }
  0x7c   : > { %p1761_p2 = por %p2109_p0, %p60_p9  ;;  %s79_s7 = sadd.s32 1, %s1466_s26 }
  0x7d   : > { %p92_p1 = scmp.ne.s32.totalorder %s1462_s25, %s1458_s24  ;;  %s2156_s17 = smov (%p46_p11, %s2154_s17), 0 }
  0x7e   : > { %2111 = sst [smem:[#allocation28_spill]] %s2156_s17  ;;  %p1774_p4 = por %p67_p12, %p66_p10 }
  0x7f   : > { %p1778_p8 = por %p92_p1, %p67_p12  ;;  %s48_s18 = ssub.s32 %s1494_s10, %s2156_s17 }
  0x80   : > { %s2112_s1 = scalar_select %p1774_p4, 1, 0 }
  0x81   : > { %s2114_s3 = scalar_select %p1778_p8, 1, 0 }
  0x82   : > { %2113 = sst [smem:[#allocation29_spill]] %s2112_s1  ;;  %p248_p5 = scmp.eq.s32.totalorder %s1741_s30, 11 }
  0x83   : > { %2115 = sst [smem:[#allocation30_spill]] %s2114_s3  ;;  %s50_s23 = sor.u32 %s49_s14, %s48_s18 }
  0x84   : > { %p77_p7 = scmp.eq.s32.totalorder %s48_s18, 0  ;;  %p51_p13 = scmp.eq.s32.totalorder %s50_s23, 0 }
  0x85   : > { %p1788_p0 = por %p248_p5, %p60_p9  ;;  %p254_p11 = scmp.eq.s32.totalorder %s941_s22, 11 }
  0x86   : > { %s1793_s5 = scalar_select %p77_p7, %s1466_s26, %s79_s7  }
  0x87   : > { %s2116_s24 = scalar_select %p1788_p0, 1, 0 }
  0x88   : > { %s1796_s20 = scalar_select %p51_p13, %s1478_s29, %s53_s16  }
  0x89   : > { %2117 = sst [smem:[#allocation31_spill]] %s2116_s24  ;;  %s274_s3 = sand.u32 1, %s1478_s29  }
  0x8a   : > { %p1802_p12 = por %p254_p11, %p66_p10  ;;  %s944_s18 = sshll.u32 %s1494_s10, 1 }
  0x8b   : > { %s282_s17 = sadd.s32 %s1490_s9, %s944_s18  ;;  %s277_s23 = scalar_lea.vmem [#allocation2], %s274_s3 }
  0x8c   : > { %s2118_s14 = scalar_select %p1802_p12, 1, 0 }
  0x8d   : > { %s286_s25 = sshll.u32 %s277_s23, 4  ;;  %s945_s30 = sshll.u32 %s282_s17, 4  ;;  %s1808_s25 = int_to_ptr.vmem [resolvable:$true] %s286_s25 }
  0x8e   : > { %s1813_s7 = scalar_lea.hbm %s2053_s0, %s945_s30  ;;  %p2119_p9 = scmp.lt.s32.totalorder %s1498_s11, 12 }
  0x8f   : > { %s1827_s17 = scalar_lea.hbm %s2055_s2, %s1671_s19  ;;  %s317_s1 = scalar_lea.vmem [#allocation7], %s1618_s13 }
  0x90   : > { %p1819_p10 = pnand %p2119_p9, %p1761_p2  ;;  %s1830_s30 = sshll.u32 %s317_s1, 4  ;;  %s325_s30 = int_to_ptr.vmem [resolvable:$true] %s1830_s30 }
  0x91   : > { %s275_s8 = scalar_lea.sflag [#allocation3], %s274_s3  ;;  %s1244_s24 = scalar_lea.hbm %s1813_s7, 16 }
  0x92   : > { %p1245_p1 = scmp.ne.s32.totalorder %s1813_s7, %s1244_s24  ;;  %p1246_p5 = pneg %p1819_p10 }
  0x93   : > { %s1249_s16 = scalar_lea.hbm %s2053_s0, 192  ;;  %p1250_p13 = scmp.lt.u32.totalorder %s1813_s7, %s2053_s0 }
  0x94   : > { %p1247_p2 = pnand %p1246_p5, %p1245_p1  ;;  %p1251_p11 = scmp.lt.u32.totalorder %s1249_s16, %s1244_s24 }
  0x95   : > { %p1253_p12 = scmp.lt.u32.totalorder %s1244_s24, %s1813_s7 }
  0x96   : > { %p1248_p7 = pneg %p1247_p2  ;;  %p1252_p9 = por %p1251_p11, %p1250_p13 }
  0x98   : > { %p1254_p0 = por %p1253_p12, %p1252_p9 }
  0x9a   : > { %p1255_p8 = pnand %p1254_p0, %p1248_p7 }
  0x9c   : > { %1258 = shalt.err (!%p1255_p8)
}
  0x9d   : > { %s1259_s3 = scalar_lea.vmem %s1808_s25, 16  ;;  %s1505_s10 = smov [#allocation2]  }
  0x9e   : > { %p1260_p1 = scmp.ne.s32.totalorder %s1808_s25, %s1259_s3  ;;  %s1264_s1 = sshll.u32 %s1505_s10, 4  ;;  %s1265_s1 = int_to_ptr.vmem [resolvable:$false] %s1264_s1 }
  0x9f   : > { %s1266_s9 = scalar_lea.vmem %s1265_s1, 32  ;;  %p1267_p3 = scmp.lt.s32.totalorder %s1808_s25, %s1265_s1 }
  0xa0   : > { %p1262_p2 = pnand %p1260_p1, %p1246_p5  ;;  %p1268_p13 = scmp.lt.s32.totalorder %s1266_s9, %s1259_s3 }
  0xa2   : > { %p1263_p4 = pneg %p1262_p2  ;;  %p1269_p11 = por %p1268_p13, %p1267_p3 }
  0xa4   : > { %p1270_p12 = pnand %p1269_p11, %p1263_p4 }
  0xa6   : > { %1273 = shalt.err (!%p1270_p12)
}
  0xa7   : > { %1024 = dma.hbm_to_vmem [thread:$0]  (!%p1819_p10), %s1813_s7, 16, %s1808_s25, %s275_s8  }
  0xa8   : > { %s1274_s24 = scalar_lea.hbm %s1827_s17, 16  ;;  %s1279_s18 = scalar_lea.hbm %s2055_s2, 96 }
  0xa9   : > { %p1275_p8 = scmp.ne.s32.totalorder %s1827_s17, %s1274_s24  ;;  %p1280_p3 = scmp.lt.u32.totalorder %s1827_s17, %s2055_s2 }
  0xaa   : > { %p1281_p4 = scmp.lt.u32.totalorder %s1279_s18, %s1274_s24  ;;  %p1283_p9 = scmp.lt.u32.totalorder %s1274_s24, %s1827_s17 }
  0xab   : > { %p1277_p0 = pnand %p1275_p8, %p1640_p6 }
  0xac   : > { %p1282_p7 = por %p1281_p4, %p1280_p3 }
  0xad   : > { %p1278_p5 = pneg %p1277_p0 }
  0xae   : > { %p1284_p1 = por %p1283_p9, %p1282_p7 }
  0xb0   : > { %p1285_p2 = pnand %p1284_p1, %p1278_p5 }
  0xb2   : > { %1288 = shalt.err (!%p1285_p2)
}
  0xb3   : > { %s1289_s25 = scalar_lea.vmem %s325_s30, 16  ;;  %s1506_s7 = smov [#allocation7]  }
  0xb4   : > { %p1290_p10 = scmp.ne.s32.totalorder %s325_s30, %s1289_s25  ;;  %s1294_s8 = sshll.u32 %s1506_s7, 4  ;;  %s1295_s8 = int_to_ptr.vmem [resolvable:$false] %s1294_s8 }
  0xb5   : > { %s1296_s10 = scalar_lea.vmem %s1295_s8, 32  ;;  %p1297_p12 = scmp.lt.s32.totalorder %s325_s30, %s1295_s8 }
  0xb6   : > { %p1292_p13 = pnand %p1290_p10, %p1640_p6  ;;  %p1298_p8 = scmp.lt.s32.totalorder %s1296_s10, %s1289_s25 }
  0xb8   : > { %p1293_p11 = pneg %p1292_p13  ;;  %p1299_p0 = por %p1298_p8, %p1297_p12 }
  0xba   : > { %p1300_p3 = pnand %p1299_p0, %p1293_p11 }
  0xbc   : > { %1303 = shalt.err (!%p1300_p3)
}
  0xbd   : > { %p2121_p4 = scmp.ne.s32.totalorder %s2096_s21, 0  ;;  %s2122_s1 = scalar_lea.sflag [#allocation6], %s1615_s12 }
  0xbe   : > { %s1881_s23 = scalar_lea.hbm %s2057_s4, %s1671_s19  ;;  %s351_s16 = scalar_lea.vmem [#allocation10], %s1618_s13 }
  0xbf   : > { %1030 = dma.hbm_to_vmem [thread:$0]  (!%p2121_p4), %s1827_s17, 16, %s325_s30, %s2122_s1  }
  0xc0   : > { %s358_s18 = sshll.u32 %s351_s16, 4  ;;  %s1304_s22 = scalar_lea.hbm %s1881_s23, 16  ;;  %s359_s18 = int_to_ptr.vmem [resolvable:$true] %s358_s18 }
  0xc1   : > { %p1305_p5 = scmp.ne.s32.totalorder %s1881_s23, %s1304_s22  ;;  %s1309_s17 = scalar_lea.hbm %s2057_s4, 96 }
  0xc2   : > { %p1310_p1 = scmp.lt.u32.totalorder %s1881_s23, %s2057_s4  ;;  %p1311_p2 = scmp.lt.u32.totalorder %s1309_s17, %s1304_s22 }
  0xc3   : > { %p1307_p7 = pnand %p1305_p5, %p1640_p6  ;;  %p1313_p13 = scmp.lt.u32.totalorder %s1304_s22, %s1881_s23 }
  0xc4   : > { %p1312_p10 = por %p1311_p2, %p1310_p1 }
  0xc5   : > { %p1308_p9 = pneg %p1307_p7 }
  0xc6   : > { %p1314_p11 = por %p1313_p13, %p1312_p10 }
  0xc8   : > { %p1315_p12 = pnand %p1314_p11, %p1308_p9 }
  0xca   : > { %1318 = shalt.err (!%p1315_p12)
}
  0xcb   : > { %s1319_s8 = scalar_lea.vmem %s359_s18, 16  ;;  %s1507_s10 = smov [#allocation10]  }
  0xcc   : > { %p1320_p8 = scmp.ne.s32.totalorder %s359_s18, %s1319_s8  ;;  %s1324_s1 = sshll.u32 %s1507_s10, 4  ;;  %s1325_s1 = int_to_ptr.vmem [resolvable:$false] %s1324_s1 }
  0xcd   : > { %s1326_s9 = scalar_lea.vmem %s1325_s1, 32  ;;  %p1327_p5 = scmp.lt.s32.totalorder %s359_s18, %s1325_s1 }
  0xce   : > { %p1322_p0 = pnand %p1320_p8, %p1640_p6  ;;  %p1328_p7 = scmp.lt.s32.totalorder %s1326_s9, %s1319_s8 }
  0xd0   : > { %p1323_p3 = pneg %p1322_p0  ;;  %p1329_p4 = por %p1328_p7, %p1327_p5 }
  0xd2   : > { %p1330_p1 = pnand %p1329_p4, %p1323_p3 }
  0xd4   : > { %1333 = shalt.err (!%p1330_p1)
}
  0xd5   : > { %p2123_p2 = scmp.ne.s32.totalorder %s2096_s21, 0  ;;  %s2124_s24 = scalar_lea.sflag [#allocation9], %s1615_s12 }
  0xd6   : > { %s1907_s3 = scalar_lea.hbm %s2059_s6, %s1671_s19  ;;  %s389_s25 = scalar_lea.vmem [#allocation13], %s1618_s13 }
  0xd7   : > { %1036 = dma.hbm_to_vmem [thread:$0]  (!%p2123_p2), %s1881_s23, 16, %s359_s18, %s2124_s24  }
  0xd8   : > { %s396_s17 = sshll.u32 %s389_s25, 4  ;;  %s1334_s30 = scalar_lea.hbm %s1907_s3, 16  ;;  %s397_s17 = int_to_ptr.vmem [resolvable:$true] %s396_s17 }
  0xd9   : > { %p1335_p4 = scmp.ne.s32.totalorder %s1907_s3, %s1334_s30  ;;  %s1339_s23 = scalar_lea.hbm %s2059_s6, 96 }
  0xda   : > { %p1340_p13 = scmp.lt.u32.totalorder %s1907_s3, %s2059_s6  ;;  %p1341_p11 = scmp.lt.u32.totalorder %s1339_s23, %s1334_s30 }
  0xdb   : > { %p1337_p9 = pnand %p1335_p4, %p1640_p6  ;;  %p1343_p8 = scmp.lt.u32.totalorder %s1334_s30, %s1907_s3 }
  0xdc   : > { %p1342_p12 = por %p1341_p11, %p1340_p13 }
  0xdd   : > { %p1338_p10 = pneg %p1337_p9 }
  0xde   : > { %p1344_p0 = por %p1343_p8, %p1342_p12 }
  0xe0   : > { %p1345_p3 = pnand %p1344_p0, %p1338_p10 }
  0xe2   : > { %1348 = shalt.err (!%p1345_p3)
}
  0xe3   : > { %s1349_s13 = scalar_lea.vmem %s397_s17, 16  ;;  %s1508_s19 = smov [#allocation13]  }
  0xe4   : > { %p1350_p5 = scmp.ne.s32.totalorder %s397_s17, %s1349_s13  ;;  %s1354_s1 = sshll.u32 %s1508_s19, 4  ;;  %s1355_s1 = int_to_ptr.vmem [resolvable:$false] %s1354_s1 }
  0xe5   : > { %s1356_s9 = scalar_lea.vmem %s1355_s1, 32  ;;  %p1357_p4 = scmp.lt.s32.totalorder %s397_s17, %s1355_s1 }
  0xe6   : > { %p1352_p7 = pnand %p1350_p5, %p1640_p6  ;;  %p1358_p9 = scmp.lt.s32.totalorder %s1356_s9, %s1349_s13 }
  0xe8   : > { %p1353_p1 = pneg %p1352_p7  ;;  %p1359_p2 = por %p1358_p9, %p1357_p4 }
  0xea   : > { %p1360_p11 = pnand %p1359_p2, %p1353_p1 }
  0xec   : > { %1363 = shalt.err (!%p1360_p11)
}
  0xed   : > { %p2125_p13 = scmp.ne.s32.totalorder %s2096_s21, 0  ;;  %s2126_s24 = scalar_lea.sflag [#allocation12], %s1615_s12 }
  0xee   : > { %s2127_s16 = sld [smem:[#allocation25_spill]] }
  0xef   : > { %1042 = dma.hbm_to_vmem [thread:$0]  (!%p2125_p13), %s1907_s3, 16, %s397_s17, %s2126_s24  }
  0xf4   : > { %p2128_p10 = scmp.ne.s32.totalorder %s2127_s16, 0 }
  0xf5   : > { %s2129_s15 = sld [smem:[#allocation29_spill]] (!%p2128_p10)  ;;  %s1932_s22 = sand.u32 (!%p2128_p10), 1, %s1474_s28  }
  0xf6   : > { %405 = sbr.rel (%p2128_p10) target bundleno = 1088 (0x440), region = 48  ;;  %s408_s25 = scalar_lea.sflag (!%p2128_p10), [#allocation3], %s1932_s22 }
  0xf7   : > { %s410_s30 = scalar_lea.vmem (!%p2128_p10), [#allocation2], %s1932_s22 }
  0xfb   : > { %p2130_p6 = scmp.ne.s32.totalorder (!%p2128_p10), %s2129_s15, 0 }
  0xfd   : > { %1437 = dma.done.wait (%p2130_p6), %s408_s25, 16  }
  0xfe   : > { %1439 = vsyncadd (%p2130_p6), %s408_s25, 4294967280  ;;  %s2131_s21 = sld [smem:[#allocation26_spill]]  ;;  %s2133_s7 = sld [smem:[#allocation30_spill]] }
  0xff   : > { %s2132_s12 = sld [smem:[#allocation20_spill]] }
 0x104   : > { %s415_s3 = sand.u32 1, %s2131_s21   ;;  %p2134_p2 = scmp.ne.s32.totalorder %s2133_s7, 0 }
 0x105   : > { %s1942_s17 = sand.u32 1, %s2132_s12   ;;  %s416_s23 = scalar_lea.sflag [#allocation6], %s415_s3 }
 0x106   : > { %s957_s8 = sshll.u32 %s1942_s17, 4 }
 0x107   : > { %s419_s18 = scalar_lea.vmem [#allocation5], %s957_s8 }
 0x108   : > { %1441 = dma.done.wait (%p2134_p2), %s416_s23, 272  }
 0x109   : > { %1443 = vsyncadd (%p2134_p2), %s416_s23, 4294967024  ;;  %s427_s10 = scalar_lea.vmem [#allocation7], %s1942_s17  ;;  %s433_s13 = scalar_lea.sflag [#allocation9], %s415_s3 }
 0x10a   : > { %s435_s19 = scalar_lea.vmem [#allocation8], %s1942_s17 }
 0x10b   : > { %1445 = dma.done.wait (%p2134_p2), %s433_s13, 32  }
 0x10c   : > { %1447 = vsyncadd (%p2134_p2), %s433_s13, 4294967264  ;;  %s958_s1 = sshll.u32 %s1942_s17, 5  ;;  %s443_s9 = scalar_lea.vmem [#allocation10], %s1942_s17 }
 0x10d   : > { %s449_s24 = scalar_lea.sflag [#allocation12], %s415_s3  ;;  %s1957_s16 = scalar_lea.vmem [#allocation11], %s958_s1 }
 0x10e   : > { %1449 = dma.done.wait (%p2134_p2), %s449_s24, 528  }
 0x10f   : > { %1451 = vsyncadd (%p2134_p2), %s449_s24, 4294966768  ;;  %v1509_v0 = vmov 0.0   ;;  %vm1510_vm0 = vmmov 0   ;;  %v1142_v1 = vld [vmem:[%s419_s18] sm:$0xff]   ;;  %v1143_v2 = vld [vmem:[%s419_s18 + $0x8] sm:$0xff]   ;;  %vm540_vm1 = vcmask 261120  }
 0x110   : > { %984 = vmatprep.subr.bf16.mxu0 %v1509_v0  ;;  %988 = vmatprep.mubr.msk.bf16.mxu0 %vm1510_vm0, %v1509_v0  ;;  %v516_v3 = vld [vmem:[%s410_s30] sm:$0x1]  ;;  %v1511_v31 = vmov 1.0   ;;  %vm612_vm3 = vcmask 517120   ;;  %v1144_v43 = vld [vmem:[%s1957_s16] sm:$0xff]   ;;  %v1145_v44 = vld [vmem:[%s1957_s16 + $0x8] sm:$0xff]  }
 0x111   : > { %992 = vmatprep.subr.bf16.mxu1 %v1509_v0  ;;  %1000 = vmatprep.mubr.msk.bf16.mxu1 %vm1510_vm0, %v1509_v0  ;;  %v959_v4 = vld [vmem:[%s427_s10] ss:$0 sm:$0xff]  ;;  %v1146_v45 = vld [vmem:[%s1957_s16 + $0x10] sm:$0xff]   ;;  %s2135_s15 = sld [smem:[#allocation21_spill]]  ;;  %s2136_s25 = sld [smem:[#allocation22_spill]]  ;;  %vm683_vm4 = vcmask 523264  }
 0x112   : > { %985 = vmatpush3.bf16.msra.mxu0 %v1142_v1  ;;  %993 = vmatpush3.bf16.msra.mxu1 %v1144_v43  ;;  %v1147_v46 = vld [vmem:[%s1957_s16 + $0x18] sm:$0xff]   ;;  %s460_s12 = scalar_lea.vmem [#allocation13], %s1942_s17  ;;  %s2137_s7 = sld [smem:[#allocation31_spill]]  ;;  %vm728_vm5 = vcmask 253952  }
 0x113   : > { %986 = vmatprep.subr.bf16.mxu0 %v1509_v0  ;;  %994 = vmatprep.subr.bf16.mxu1 %v1509_v0  ;;  %v963_v51 = vld [vmem:[%s435_s19] ss:$0 sm:$0xff]  ;;  %s514_s8 = scalar_lea.vmem [#allocation14], %s1932_s22  ;;  %s2138_s13 = sld [smem:[#allocation35_spill]] }
 0x114   : > { %v964_v53 = vld [vmem:[%s443_s9] ss:$0 sm:$0xff]  ;;  %s745_s23 = sshll.u32 %s514_s8, 4  ;;  %s731_s17 = scalar_lea.sflag [#allocation4], %s1932_s22  ;;  %s1992_s23 = int_to_ptr.vmem [resolvable:$true] %s745_s23 }
 0x115   : > { %v965_v57 = vld [vmem:[%s460_s12] ss:$0 sm:$0xff]  ;;  %s1364_s1 = scalar_lea.vmem %s1992_s23, 16  ;;  %s1512_s9 = smov [#allocation14]  }
 0x116   : > { %987 = vmatpush3.bf16.msra.mxu0 %v1143_v2  ;;  %995 = vmatpush3.bf16.msra.mxu1 %v1145_v44  ;;  %p1365_p12 = scmp.ne.s32.totalorder %s1992_s23, %s1364_s1  ;;  %s1368_s24 = sshll.u32 %s1512_s9, 4  ;;  %s1369_s24 = int_to_ptr.vmem [resolvable:$false] %s1368_s24 }
 0x117   : > { %996 = vmatprep.subr.bf16.mxu1 %v1509_v0  ;;  %s1004_s30 = smul.u32 6, %s2135_s15  ;;  %s1370_s16 = scalar_lea.vmem %s1369_s24, 32 }
 0x118   : > { %p2139_p8 = scmp.ne.s32.totalorder %s2137_s7, 0  ;;  %p1371_p5 = scmp.lt.s32.totalorder %s1992_s23, %s1369_s24 }
 0x119   : > { %989 = vmatmul.mubr.msk.bf16.vlgmr.msra.gmra.mrb[0].mxu0 %vm540_vm1, %v516_v3  ;;  %s741_s21 = sadd.s32 %s2136_s25, %s1004_s30  ;;  %p1372_p7 = scmp.lt.s32.totalorder %s1370_s16, %s1364_s1 }
 0x11a   : > { %997 = vmatpush3.bf16.msra.mxu1 %v1146_v45  ;;  %s971_s3 = sshll.u32 %s741_s21, 4  ;;  %p1366_p0 = pnand %p1365_p12, %p2139_p8 }
 0x11b   : > { %998 = vmatprep.subr.bf16.mxu1 %v1509_v0  ;;  %s1990_s19 = scalar_lea.hbm %s2138_s13, %s971_s3  ;;  %p1373_p1 = por %p1372_p7, %p1371_p5 }
 0x11c   : > { %p1367_p3 = pneg %p1366_p0 }
 0x11e   : > { %999 = vmatpush3.bf16.msra.mxu1 %v1147_v46  ;;  %p1374_p4 = pnand %p1373_p1, %p1367_p3 }
 0x1ec   : > { %v578_v5 = vpop.f32.mrb[0].mxu0 }
 0x1ed   : > { %v579_v6 = vadd.f32 %v959_v4, %v578_v5  ;;  %v990_v7 = vpop.f32.mrb[1].mxu0 }
 0x1ee   : > { %v581_v8 = vpop.f32.mrb[2].mxu0 }
 0x1ef   : > { %v585_v9 = vmul.f32 0.70710677, %v579_v6  ;;  %v991_v10 = vpop.f32.mrb[3].mxu0  ;;  %v584_v34 = vmul.f32 0.5, %v579_v6 }
 0x1f1   : > { %v588_v11 = vsub.f32 0.0, %v585_v9  ;;  %vm586_vm2 = vcmp.lt.f32.partialorder %v585_v9, 0.0 }
 0x1f2   : > { %v587_v32 = vsel %vm586_vm2, -1.0, %v1511_v31 }
 0x1f3   : > { %v589_v12 = vsel %vm586_vm2, %v588_v11, %v585_v9 }
 0x1f4   : > { %v590_v13 = vmul.f32 0.3275911, %v589_v12  ;;  %v603_v15 = vsub.f32 0.0, %v589_v12 }
 0x1f6   : > { %v591_v14 = vadd.f32 1.0, %v590_v13  ;;  %v604_v17 = vmul.f32 %v603_v15, %v589_v12 }
 0x1f8   : > { %1148 = vrcp.f32 %v591_v14  ;;  %v605_v20 = vmul.f32 1.442695, %v604_v17 }
 0x1fa   : > { %1150 = vpow2.f32 %v605_v20 }
 0x202   : > { %v1149_v16 = vpop.eup %1148 }
 0x203   : > { %v594_v18 = vmul.f32 1.0614054, %v1149_v16 }
 0x204   : > { %v1151_v28 = vpop.eup %1150 }
 0x205   : > { %v595_v19 = vadd.f32 -1.4531521, %v594_v18 }
 0x207   : > { %v596_v21 = vmul.f32 %v1149_v16, %v595_v19 }
 0x209   : > { %v597_v22 = vadd.f32 1.4214138, %v596_v21 }
 0x20b   : > { %v598_v23 = vmul.f32 %v1149_v16, %v597_v22 }
 0x20d   : > { %v599_v24 = vadd.f32 -0.28449672, %v598_v23 }
 0x20f   : > { %v600_v25 = vmul.f32 %v1149_v16, %v599_v24 }
 0x211   : > { %v601_v26 = vadd.f32 0.2548296, %v600_v25 }
 0x213   : > { %v602_v27 = vmul.f32 %v1149_v16, %v601_v26 }
 0x215   : > { %v607_v29 = vmul.f32 %v1151_v28, %v602_v27 }
 0x217   : > { %v608_v30 = vsub.f32 1.0, %v607_v29 }
 0x219   : > { %v609_v33 = vmul.f32 %v608_v30, %v587_v32 }
 0x21b   : > { %v610_v35 = vadd.f32 1.0, %v609_v33 }
 0x21d   : > { %v611_v36 = vmul.f32 %v610_v35, %v584_v34 }
 0x21f   : > { %v613_v37 = vsel %vm612_vm3, %v611_v36, 0.0 }
 0x220   : > { %614 = vadd.xlane.f32.xlu0 %v613_v37 }
 0x2ad   : > { %v615_v38 = vpop.xlane.xlu0 %614 }
 0x2ae   : > { %v617_v39 = vmul.f32 0.015625, %v615_v38 }
 0x2b0   : > { %v618_v40 = vsub.f32 %v611_v36, %v617_v39 }
 0x2b2   : > { %v619_v41 = vmul.f32 %v618_v40, %v618_v40 }
 0x2b4   : > { %v620_v42 = vsel %vm612_vm3, %v619_v41, 0.0 }
 0x2b5   : > { %621 = vadd.xlane.f32.xlu0 %v620_v42 }
 0x342   : > { %v622_v47 = vpop.xlane.xlu0 %621 }
 0x343   : > { %v623_v48 = vmul.f32 0.015625, %v622_v47 }
 0x345   : > { %v624_v49 = vadd.f32 1e-05, %v623_v48 }
 0x347   : > { %1152 = vrsqrt.f32 %v624_v49 }
 0x351   : > { %v1153_v50 = vpop.eup %1152 }
 0x352   : > { %v626_v52 = vmul.f32 %v1153_v50, %v618_v40 }
 0x354   : > { %v634_v54 = vmul.f32 %v963_v51, %v626_v52 }
 0x356   : > { %v642_v55 = vadd.f32 %v964_v53, %v634_v54 }
 0x358   : > { %v643_v56 = vpack.c.bf16 %v642_v55, %v642_v55 }
 0x35a   : > { %1001 = vmatmul.mubr.msk.bf16.vlgmr.msra.gmra.mrb[0].mxu1 %vm683_vm4, %v643_v56 }
 0x42d   : > { %v721_v58 = vpop.f32.mrb[0].mxu1 }
 0x42e   : > { %v722_v59 = vadd.f32 %v965_v57, %v721_v58  ;;  %v1002_v60 = vpop.f32.mrb[1].mxu1 }
 0x42f   : > { %v724_v61 = vpop.f32.mrb[2].mxu1 }
 0x430   : > { %v727_v62 = vpack.c.bf16 %v722_v59, %v722_v59  ;;  %v1003_v63 = vpop.f32.mrb[3].mxu1 }
 0x432   : > { %729 = vst.msk [vmem:[%s514_s8] sm:$0x1] %vm728_vm5, %v727_v62 }
 0x433   : > { %1377 = shalt.err (!%p1374_p4)
}
 0x434   : > { %s1378_s22 = scalar_lea.hbm %s1990_s19, 16  ;;  %s1382_s30 = scalar_lea.hbm %s2138_s13, 192 }
 0x435   : > { %p1379_p9 = scmp.ne.s32.totalorder %s1990_s19, %s1378_s22  ;;  %p1383_p10 = scmp.lt.u32.totalorder %s1990_s19, %s2138_s13 }
 0x436   : > { %p1384_p6 = scmp.lt.u32.totalorder %s1382_s30, %s1378_s22  ;;  %p1386_p12 = scmp.lt.u32.totalorder %s1378_s22, %s1990_s19 }
 0x437   : > { %p1380_p11 = pnand %p1379_p9, %p2139_p8 }
 0x438   : > { %p1385_p2 = por %p1384_p6, %p1383_p10 }
 0x439   : > { %p1381_p13 = pneg %p1380_p11 }
 0x43a   : > { %p1387_p0 = por %p1386_p12, %p1385_p2 }
 0x43c   : > { %p1388_p3 = pnand %p1387_p0, %p1381_p13 }
 0x43e   : > { %1391 = shalt.err (!%p1388_p3)
}
 0x43f   : > { %1019 = dma.vmem_to_hbm [thread:$0]  (%p2139_p8), %s1992_s23, 16, %s1990_s19, %s731_s17  }
 0x440 PF: > { %p1048_p5 = scmp.ge.s32.totalorder %s1498_s11, 2  ;;  %s757_s3 = sand.u32 1, %s1470_s27  }
 0x441   : > { %p2140_p7 = scmp.ne.s32.totalorder %s2118_s14, 0  ;;  %s758_s8 = scalar_lea.sflag [#allocation4], %s757_s3 }
 0x443   : > { %p1044_p1 = pnand %p1048_p5, %p2140_p7 }
 0x445   : > { %1453 = dma.done.wait (!%p1044_p1), %s758_s8, 16  }
 0x446   : > { %1455 = vsyncadd (!%p1044_p1), %s758_s8, 4294967280  ;;  %s32_s11 = sadd.s32 1, %s1498_s11   ;;  %s2141_s24 = sld [smem:[#allocation20_spill]] }
 0x447   : > { %p29_p4 = scmp.ge.s32.totalorder %s32_s11, 14   ;;  %s2142_s30 = sld [smem:[#allocation23_spill]] }
 0x448   : > { %s2143_s8 = sld [smem:[#allocation24_spill]]  ;;  %s2144_s9 = sld [smem:[#allocation27_spill]] }
 0x449   : > { %s2145_s10 = sld [smem:[#allocation28_spill]]  ;;  %s2146_s25 = smov %s1466_s26 }
 0x44a   : > { %s2147_s26 = smov %s1793_s5  ;;  %s2148_s27 = smov %s1474_s28 }
 0x44b   : > { %s2149_s28 = smov %s1478_s29  ;;  %s2150_s29 = smov %s1796_s20 }
 0x44c   :  { %31 = sbr.rel (!%p29_p4) target bundleno = 20 (0x14), region = 165 }
 0x453   :  { %762 = vsyncpa [#allocation3], 1 }
 0x454   :  { %764 = vsyncpa [#allocation3 + $0x1], 1 }
 0x455   :  { %765 = vsyncpa [#allocation6], 1 }
 0x456   :  { %767 = vsyncpa [#allocation6 + $0x1], 1 }
 0x457   :  { %768 = vsyncpa [#allocation9], 1 }
 0x458   :  { %770 = vsyncpa [#allocation9 + $0x1], 1 }
 0x459   :  { %771 = vsyncpa [#allocation12], 1 }
 0x45a   :  { %773 = vsyncpa [#allocation12 + $0x1], 1 }
 0x45b   :  { %774 = vsyncpa [#allocation4], 1 }
 0x45c   :  { %776 = vsyncpa [#allocation4 + $0x1], 1 }

</bundles_post_ra>
